<compile_context>
chip_gen: v6e
topology: v6e:2x2x1
jax: 0.10.0
libtpu: 0.0.40
codegen_flags: <defaults>
</compile_context>

<pallas_src>
import jax
import jax.numpy as jnp
from jax import lax
from jax.experimental import pallas as pl
from jax.experimental.pallas import tpu as pltpu

EPS = 1e-5
SLOPE = 0.01  # nn.LeakyReLU default negative_slope


def _leaky(v):
    return jnp.where(v >= 0, v, SLOPE * v)


def _residual_stack_forward(x_nchw, params):
    """NCHW in / NCHW out.  Kernel runs on a lane-dense (N*H, W*C) layout."""
    w1, g1, b1, w2, g2, b2 = params
    x_nhwc = jnp.transpose(x_nchw, (0, 2, 3, 1)).astype(jnp.float32)
    N, H, W, C = x_nhwc.shape
    L = w1.shape[0]
    NH, WC = N * H, W * C
    M = N * H * W
    assert WC % 128 == 0, "lane-dense layout needs W*C to be a multiple of 128"
    assert W & (W - 1) == 0, "roll-based BN reduction needs W to be a power of 2"

    # ---- weight / layout prep (compiled once under jit) ----
    # 3x3 conv: fold kx (pixel w-1 / w / w+1) into a block-tridiagonal weight.
    # Rows of the matmul are indexed (ky, w_in, c), columns (w_out, d).
    shift_mats = jnp.stack([jnp.eye(W, k=1, dtype=jnp.float32),    # kx=0 -> input pixel w-1
                            jnp.eye(W, k=0, dtype=jnp.float32),    # kx=1 -> input pixel w
                            jnp.eye(W, k=-1, dtype=jnp.float32)])  # kx=2 -> input pixel w+1
    w1big = jnp.einsum('xwv,lyxcd->lywcvd', shift_mats, w1) \
               .reshape(L, 3 * WC, WC).astype(jnp.bfloat16)
    # 1x1 conv -> block-diagonal (WC, WC) per layer (stays lane-dense).
    w2big = jnp.einsum('wv,lcd->lwcvd', jnp.eye(W, dtype=jnp.float32), w2) \
               .reshape(L, WC, WC).astype(jnp.bfloat16)
    # BN gamma/beta tiled to the (w, c) lane pattern (broadcast-ready).
    g1w = jnp.tile(g1, (1, W)).reshape(L, 1, WC)
    b1w = jnp.tile(b1, (1, W)).reshape(L, 1, WC)
    g2w = jnp.tile(g2, (1, W)).reshape(L, 1, WC)
    b2w = jnp.tile(b2, (1, W)).reshape(L, 1, WC)

    x2 = x_nhwc.reshape(NH, WC)          # zero-cost contiguous reshape
    inv_m = 1.0 / float(M)

    def kernel(x_ref, w1_ref, g1_ref, b1_ref, w2_ref, g2_ref, b2_ref, o_ref):
        state = x_ref[...]                                     # (NH, WC) f32

        # Hoisted once: per-image row-boundary masks + zero row for the shifts.
        row_h = lax.broadcasted_iota(jnp.int32, (NH, 1), 0) % H
        up_mask = jnp.broadcast_to((row_h > 0).astype(jnp.float32), (NH, WC))
        dn_mask = jnp.broadcast_to((row_h < H - 1).astype(jnp.float32), (NH, WC))
        zrow = jnp.zeros((1, WC), jnp.float32)

        def channel_moments(v):
            # v: (NH, WC) f32 -> (mean, E[x^2]) per channel, replicated across
            # the W lane groups via log2(W) XLU roll-and-add steps.
            s = jnp.concatenate([jnp.sum(v, axis=0, keepdims=True),
                                 jnp.sum(v * v, axis=0, keepdims=True)], axis=0)
            sh = C
            while sh < WC:                                     # static unroll
                s = s + pltpu.roll(s, shift=sh, axis=1)
                sh *= 2
            s = s * inv_m
            return s[0:1], s[1:2]

        for l in range(L):                                     # small static L
            y = _leaky(state)                                  # lane-dense VPU
            # 3 ky row slabs (h-1 / h / h+1), zero outside each image.
            y_up = jnp.concatenate([zrow, y[:NH - 1, :]], axis=0) * up_mask
            y_dn = jnp.concatenate([y[1:, :], zrow], axis=0) * dn_mask
            cols = jnp.concatenate([y_up, y, y_dn], axis=1).astype(jnp.bfloat16)

            # 3x3 conv == one (NH, 3*WC) x (3*WC, WC) bf16 matmul, f32 acc.
            z = jnp.dot(cols, w1_ref[l], preferred_element_type=jnp.float32)

            # ---- BatchNorm 1: single pass, fp32 stats, folded affine ----
            mean1, msq1 = channel_moments(z)
            a1 = g1_ref[l] * lax.rsqrt(msq1 - mean1 * mean1 + EPS)   # EUP
            c1 = b1_ref[l] - mean1 * a1
            z = _leaky(z * a1 + c1)

            # ---- 1x1 conv (block-diagonal weight keeps the lane-dense layout) ----
            u = jnp.dot(z.astype(jnp.bfloat16), w2_ref[l],
                        preferred_element_type=jnp.float32)

            # ---- BatchNorm 2 + residual add ----
            mean2, msq2 = channel_moments(u)
            a2 = g2_ref[l] * lax.rsqrt(msq2 - mean2 * mean2 + EPS)
            c2 = b2_ref[l] - mean2 * a2
            state = state + u * a2 + c2

        o_ref[...] = _leaky(state)                             # unmasked 128-lane store

    flops = L * (2 * NH * (3 * WC) * WC        # 3x3 conv (block-tridiagonal matmul)
                 + 2 * NH * WC * WC)           # 1x1 conv
    bytes_accessed = (2 * NH * WC * 4 + int(w1big.size) * 2 + int(w2big.size) * 2
                      + 4 * L * WC * 4)
    cost = pl.CostEstimate(flops=int(flops), transcendentals=int(2 * L * WC),
                           bytes_accessed=int(bytes_accessed))

    # TODO(synk): for non-toy shapes add a 'parallel' grid over N (or H-row blocks
    # with a 1-row halo) so both v7x TensorCores run (BN stats then need a two-phase
    # cross-core reduction), and move the layer loop onto an 'arbitrary' grid axis
    # with per-layer weight BlockSpecs so weights stream from HBM instead of being
    # all-resident (v7x VMEM is 64 MiB); once C >= 128 switch to a channels-on-lanes
    # (N*H*W, C) layout to remove the kron weight inflation and fill the MXU rows.
    out2 = pl.pallas_call(
        kernel,
        out_shape=jax.ShapeDtypeStruct((NH, WC), jnp.float32),
        in_specs=[pl.BlockSpec(memory_space=pltpu.MemorySpace.VMEM)] * 7,
        out_specs=pl.BlockSpec(memory_space=pltpu.MemorySpace.VMEM),
        input_output_aliases={0: 0},
        compiler_params=pltpu.CompilerParams(vmem_limit_bytes=32 * 1024 * 1024),
        cost_estimate=cost,
    )(x2, w1big, g1w, b1w, w2big, g2w, b2w)

    out_nhwc = out2.reshape(N, H, W, C)
    return jnp.transpose(out_nhwc, (0, 3, 1, 2))  # back to NCHW


residual_stack_forward = jax.jit(_residual_stack_forward)


def init_params(key, layers, channels):
    """Deterministic synthetic parameters (no checkpoint load)."""
    k1, k2, k3, k4, k5, k6 = jax.random.split(key, 6)
    C, L = channels, layers
    w1 = 0.1 * jax.random.normal(k1, (L, 3, 3, C, C), jnp.float32)  # HWIO per layer
    w2 = 0.1 * jax.random.normal(k2, (L, C, C), jnp.float32)        # [c_in, c_out]
    g1 = 1.0 + 0.1 * jax.random.normal(k3, (L, C), jnp.float32)
    b1 = 0.1 * jax.random.normal(k4, (L, C), jnp.float32)
    g2 = 1.0 + 0.1 * jax.random.normal(k5, (L, C), jnp.float32)
    b2 = 0.1 * jax.random.normal(k6, (L, C), jnp.float32)
    return (w1, g1, b1, w2, g2, b2)


@jax.jit
def reference_forward(x_nchw, params):
    """Pure-JAX reference with matched math (bf16 at the dots, fp32 BN stats)."""
    w1, g1, b1, w2, g2, b2 = params
    x = jnp.transpose(x_nchw, (0, 2, 3, 1)).astype(jnp.float32)
    N, H, W, C = x.shape
    L = w1.shape[0]
    for l in range(L):
        y = _leaky(x)
        yp = jnp.pad(y, ((0, 0), (1, 1), (1, 1), (0, 0))).astype(jnp.bfloat16)
        w1b = w1[l].astype(jnp.bfloat16)
        z = jnp.zeros((N, H, W, C), jnp.float32)
        for ky in range(3):
            for kx in range(3):
                z = z + jnp.einsum('nhwc,cd->nhwd',
                                   yp[:, ky:ky + H, kx:kx + W, :],
                                   w1b[ky, kx],
                                   preferred_element_type=jnp.float32)
        zf = z.reshape(-1, C)
        m1 = zf.mean(0, keepdims=True)
        v1 = ((zf - m1) ** 2).mean(0, keepdims=True)
        zf = (zf - m1) * lax.rsqrt(v1 + EPS) * g1[l] + b1[l]
        zf = _leaky(zf)
        u = jnp.einsum('mc,cd->md', zf.astype(jnp.bfloat16),
                       w2[l].astype(jnp.bfloat16),
                       preferred_element_type=jnp.float32)
        m2 = u.mean(0, keepdims=True)
        v2 = ((u - m2) ** 2).mean(0, keepdims=True)
        u = (u - m2) * lax.rsqrt(v2 + EPS) * g2[l] + b2[l]
        x = x + u.reshape(N, H, W, C)
    return jnp.transpose(_leaky(x), (0, 3, 1, 2))


if __name__ == "__main__":
    # batch=2, channels=8 (== hidden so the residual shape-checks),
    # spatial 16x16 (W*C = 128 -> exactly one lane tile), 4 residual layers.
    N, C, H, W = 2, 8, 16, 16
    LAYERS = 4

    key = jax.random.PRNGKey(0)
    kx_, kp = jax.random.split(key)
    x = jax.random.normal(kx_, (N, C, H, W), jnp.float32)
    params = init_params(kp, LAYERS, C)

    out = jax.block_until_ready(residual_stack_forward(x, params))
    ref = jax.block_until_ready(reference_forward(x, params))

    assert out.shape == (N, C, H, W)
    err = float(jnp.max(jnp.abs(out - ref)))
    # bf16 at the MXU (fp32 accumulation / fp32 BN stats): error ~1e-4 expected;
    # tolerance leaves headroom for accumulation-order differences.
    assert jnp.allclose(out, ref, rtol=1e-2, atol=1e-2), err
    print("KERNEL_OK")
</pallas_src>

<mosaic_0001>
module attributes {stable_mosaic.version = 11 : i64} {
  func.func @kernel(%arg0: memref<32x128xf32, #tpu.memory_space<vmem>>, %arg1: memref<4x384x128xbf16, #tpu.memory_space<vmem>>, %arg2: memref<4x1x128xf32, #tpu.memory_space<vmem>>, %arg3: memref<4x1x128xf32, #tpu.memory_space<vmem>>, %arg4: memref<4x128x128xbf16, #tpu.memory_space<vmem>>, %arg5: memref<4x1x128xf32, #tpu.memory_space<vmem>>, %arg6: memref<4x1x128xf32, #tpu.memory_space<vmem>>, %arg7: memref<32x128xf32, #tpu.memory_space<vmem>>) attributes {dimension_semantics = [], scalar_prefetch = 0 : i64, scratch_operands = 0 : i64, tpu.core_type = #tpu.core_type<tc>} {
    %c0 = arith.constant 0 : index
    %c0_0 = arith.constant 0 : index
    %0 = vector.load %arg0[%c0, %c0_0] : memref<32x128xf32, #tpu.memory_space<vmem>>, vector<32x128xf32>
    %1 = tpu.iota {dimensions = array<i32: 0>} : vector<32x1xi32>
    %c16_i32 = arith.constant 16 : i32
    %c0_i32 = arith.constant 0 : i32
    %2 = arith.cmpi eq, %c16_i32, %c0_i32 : i32
    %c1_i32 = arith.constant 1 : i32
    %3 = arith.select %2, %c1_i32, %c16_i32 : i32
    %4 = vector.broadcast %3 : i32 to vector<32x1xi32>
    %5 = arith.remsi %1, %4 : vector<32x1xi32>
    %c0_i32_1 = arith.constant 0 : i32
    %6 = vector.broadcast %c0_i32_1 : i32 to vector<32x1xi32>
    %7 = arith.cmpi ne, %5, %6 : vector<32x1xi32>
    %c0_i32_2 = arith.constant 0 : i32
    %8 = vector.broadcast %c0_i32_2 : i32 to vector<32x1xi32>
    %9 = arith.cmpi slt, %5, %8 : vector<32x1xi32>
    %c0_i32_3 = arith.constant 0 : i32
    %10 = arith.cmpi slt, %3, %c0_i32_3 : i32
    %11 = vector.broadcast %10 : i1 to vector<32x1xi1>
    %12 = vector.broadcast %11 : vector<32x1xi1> to vector<32x1xi1>
    %13 = arith.xori %9, %12 : vector<32x1xi1>
    %14 = arith.andi %13, %7 : vector<32x1xi1>
    %15 = vector.broadcast %3 : i32 to vector<32x1xi32>
    %16 = arith.addi %5, %15 : vector<32x1xi32>
    %17 = arith.select %14, %16, %5 : vector<32x1xi1>, vector<32x1xi32>
    %c0_i32_4 = arith.constant 0 : i32
    %18 = vector.broadcast %c0_i32_4 : i32 to vector<32x1xi32>
    %19 = arith.cmpi sgt, %17, %18 : vector<32x1xi32>
    %20 = arith.extui %19 : vector<32x1xi1> to vector<32x1xi32>
    %21 = arith.sitofp %20 : vector<32x1xi32> to vector<32x1xf32>
    %22 = vector.shape_cast %21 : vector<32x1xf32> to vector<32x1xf32>
    %23 = vector.broadcast %22 : vector<32x1xf32> to vector<32x128xf32>
    %c15_i32 = arith.constant 15 : i32
    %24 = vector.broadcast %c15_i32 : i32 to vector<32x1xi32>
    %25 = arith.cmpi slt, %17, %24 : vector<32x1xi32>
    %26 = arith.extui %25 : vector<32x1xi1> to vector<32x1xi32>
    %27 = arith.sitofp %26 : vector<32x1xi32> to vector<32x1xf32>
    %28 = vector.shape_cast %27 : vector<32x1xf32> to vector<32x1xf32>
    %29 = vector.broadcast %28 : vector<32x1xf32> to vector<32x128xf32>
    %cst = arith.constant 0.000000e+00 : f32
    %30 = vector.broadcast %cst : f32 to vector<1x128xf32>
    %cst_5 = arith.constant 0.000000e+00 : f32
    %31 = vector.broadcast %cst_5 : f32 to vector<32x128xf32>
    %32 = arith.cmpf oge, %0, %31 : vector<32x128xf32>
    %cst_6 = arith.constant 0.00999999977 : f32
    %33 = vector.broadcast %cst_6 : f32 to vector<32x128xf32>
    %34 = arith.mulf %33, %0 : vector<32x128xf32>
    %35 = arith.select %32, %0, %34 : vector<32x128xi1>, vector<32x128xf32>
    %36 = vector.extract_strided_slice %35 {offsets = [0, 0], sizes = [31, 128], strides = [1, 1]} : vector<32x128xf32> to vector<31x128xf32>
    %37 = tpu.concatenate %30, %36 in 0 : vector<1x128xf32>, vector<31x128xf32> -> vector<32x128xf32>
    %38 = arith.mulf %37, %23 : vector<32x128xf32>
    %39 = vector.extract_strided_slice %35 {offsets = [1, 0], sizes = [31, 128], strides = [1, 1]} : vector<32x128xf32> to vector<31x128xf32>
    %40 = tpu.concatenate %39, %30 in 0 : vector<31x128xf32>, vector<1x128xf32> -> vector<32x128xf32>
    %41 = arith.mulf %40, %29 : vector<32x128xf32>
    %42 = tpu.concatenate %38, %35, %41 in 1 : vector<32x128xf32>, vector<32x128xf32>, vector<32x128xf32> -> vector<32x384xf32>
    %43 = arith.truncf %42 : vector<32x384xf32> to vector<32x384xbf16>
    %c0_7 = arith.constant 0 : index
    %c0_8 = arith.constant 0 : index
    %c0_9 = arith.constant 0 : index
    %44 = vector.load %arg1[%c0_7, %c0_8, %c0_9] : memref<4x384x128xbf16, #tpu.memory_space<vmem>>, vector<1x384x128xbf16>
    %45 = vector.shape_cast %44 : vector<1x384x128xbf16> to vector<384x128xbf16>
    %cst_10 = arith.constant dense<0.000000e+00> : vector<32x128xf32>
    %46 = tpu.matmul %43, %45, %cst_10 {dimension_numbers = #tpu.dot_dimension_numbers<[1], [0], [0], [1], [0, 0, 1, 1], [], []>} : vector<32x384xbf16>, vector<384x128xbf16>, vector<32x128xf32> -> vector<32x128xf32>
    %cst_11 = arith.constant dense<0.000000e+00> : vector<128xf32>
    %47 = vector.multi_reduction <add>, %46, %cst_11 [0] : vector<32x128xf32> to vector<128xf32>
    %48 = vector.shape_cast %47 : vector<128xf32> to vector<1x128xf32>
    %49 = arith.mulf %46, %46 : vector<32x128xf32>
    %cst_12 = arith.constant dense<0.000000e+00> : vector<128xf32>
    %50 = vector.multi_reduction <add>, %49, %cst_12 [0] : vector<32x128xf32> to vector<128xf32>
    %51 = vector.shape_cast %50 : vector<128xf32> to vector<1x128xf32>
    %52 = tpu.concatenate %48, %51 in 0 : vector<1x128xf32>, vector<1x128xf32> -> vector<2x128xf32>
    %c8_i32 = arith.constant 8 : i32
    %53 = tpu.dynamic_rotate %52 by %c8_i32 dim 1 : vector<2x128xf32>, i32 -> vector<2x128xf32>
    %54 = arith.addf %52, %53 : vector<2x128xf32>
    %c16_i32_13 = arith.constant 16 : i32
    %55 = tpu.dynamic_rotate %54 by %c16_i32_13 dim 1 : vector<2x128xf32>, i32 -> vector<2x128xf32>
    %56 = arith.addf %54, %55 : vector<2x128xf32>
    %c32_i32 = arith.constant 32 : i32
    %57 = tpu.dynamic_rotate %56 by %c32_i32 dim 1 : vector<2x128xf32>, i32 -> vector<2x128xf32>
    %58 = arith.addf %56, %57 : vector<2x128xf32>
    %c64_i32 = arith.constant 64 : i32
    %59 = tpu.dynamic_rotate %58 by %c64_i32 dim 1 : vector<2x128xf32>, i32 -> vector<2x128xf32>
    %60 = arith.addf %58, %59 : vector<2x128xf32>
    %cst_14 = arith.constant 0.001953125 : f32
    %61 = vector.broadcast %cst_14 : f32 to vector<2x128xf32>
    %62 = arith.mulf %60, %61 : vector<2x128xf32>
    %63 = vector.extract_strided_slice %62 {offsets = [0, 0], sizes = [1, 128], strides = [1, 1]} : vector<2x128xf32> to vector<1x128xf32>
    %64 = vector.extract_strided_slice %62 {offsets = [1, 0], sizes = [1, 128], strides = [1, 1]} : vector<2x128xf32> to vector<1x128xf32>
    %c0_15 = arith.constant 0 : index
    %c0_16 = arith.constant 0 : index
    %c0_17 = arith.constant 0 : index
    %65 = vector.load %arg2[%c0_15, %c0_16, %c0_17] : memref<4x1x128xf32, #tpu.memory_space<vmem>>, vector<1x1x128xf32>
    %66 = vector.shape_cast %65 : vector<1x1x128xf32> to vector<1x128xf32>
    %67 = arith.mulf %63, %63 : vector<1x128xf32>
    %68 = arith.subf %64, %67 : vector<1x128xf32>
    %cst_18 = arith.constant 9.99999974E-6 : f32
    %69 = vector.broadcast %cst_18 : f32 to vector<1x128xf32>
    %70 = arith.addf %68, %69 : vector<1x128xf32>
    %71 = math.rsqrt %70 : vector<1x128xf32>
    %72 = arith.mulf %66, %71 : vector<1x128xf32>
    %c0_19 = arith.constant 0 : index
    %c0_20 = arith.constant 0 : index
    %c0_21 = arith.constant 0 : index
    %73 = vector.load %arg3[%c0_19, %c0_20, %c0_21] : memref<4x1x128xf32, #tpu.memory_space<vmem>>, vector<1x1x128xf32>
    %74 = vector.shape_cast %73 : vector<1x1x128xf32> to vector<1x128xf32>
    %75 = arith.mulf %63, %72 : vector<1x128xf32>
    %76 = arith.subf %74, %75 : vector<1x128xf32>
    %77 = vector.broadcast %72 : vector<1x128xf32> to vector<32x128xf32>
    %78 = arith.mulf %46, %77 : vector<32x128xf32>
    %79 = vector.broadcast %76 : vector<1x128xf32> to vector<32x128xf32>
    %80 = arith.addf %78, %79 : vector<32x128xf32>
    %cst_22 = arith.constant 0.000000e+00 : f32
    %81 = vector.broadcast %cst_22 : f32 to vector<32x128xf32>
    %82 = arith.cmpf oge, %80, %81 : vector<32x128xf32>
    %cst_23 = arith.constant 0.00999999977 : f32
    %83 = vector.broadcast %cst_23 : f32 to vector<32x128xf32>
    %84 = arith.mulf %83, %80 : vector<32x128xf32>
    %85 = arith.select %82, %80, %84 : vector<32x128xi1>, vector<32x128xf32>
    %86 = arith.truncf %85 : vector<32x128xf32> to vector<32x128xbf16>
    %c0_24 = arith.constant 0 : index
    %c0_25 = arith.constant 0 : index
    %c0_26 = arith.constant 0 : index
    %87 = vector.load %arg4[%c0_24, %c0_25, %c0_26] : memref<4x128x128xbf16, #tpu.memory_space<vmem>>, vector<1x128x128xbf16>
    %88 = vector.shape_cast %87 : vector<1x128x128xbf16> to vector<128x128xbf16>
    %cst_27 = arith.constant dense<0.000000e+00> : vector<32x128xf32>
    %89 = tpu.matmul %86, %88, %cst_27 {dimension_numbers = #tpu.dot_dimension_numbers<[1], [0], [0], [1], [0, 0, 1, 1], [], []>} : vector<32x128xbf16>, vector<128x128xbf16>, vector<32x128xf32> -> vector<32x128xf32>
    %cst_28 = arith.constant dense<0.000000e+00> : vector<128xf32>
    %90 = vector.multi_reduction <add>, %89, %cst_28 [0] : vector<32x128xf32> to vector<128xf32>
    %91 = vector.shape_cast %90 : vector<128xf32> to vector<1x128xf32>
    %92 = arith.mulf %89, %89 : vector<32x128xf32>
    %cst_29 = arith.constant dense<0.000000e+00> : vector<128xf32>
    %93 = vector.multi_reduction <add>, %92, %cst_29 [0] : vector<32x128xf32> to vector<128xf32>
    %94 = vector.shape_cast %93 : vector<128xf32> to vector<1x128xf32>
    %95 = tpu.concatenate %91, %94 in 0 : vector<1x128xf32>, vector<1x128xf32> -> vector<2x128xf32>
    %c8_i32_30 = arith.constant 8 : i32
    %96 = tpu.dynamic_rotate %95 by %c8_i32_30 dim 1 : vector<2x128xf32>, i32 -> vector<2x128xf32>
    %97 = arith.addf %95, %96 : vector<2x128xf32>
    %c16_i32_31 = arith.constant 16 : i32
    %98 = tpu.dynamic_rotate %97 by %c16_i32_31 dim 1 : vector<2x128xf32>, i32 -> vector<2x128xf32>
    %99 = arith.addf %97, %98 : vector<2x128xf32>
    %c32_i32_32 = arith.constant 32 : i32
    %100 = tpu.dynamic_rotate %99 by %c32_i32_32 dim 1 : vector<2x128xf32>, i32 -> vector<2x128xf32>
    %101 = arith.addf %99, %100 : vector<2x128xf32>
    %c64_i32_33 = arith.constant 64 : i32
    %102 = tpu.dynamic_rotate %101 by %c64_i32_33 dim 1 : vector<2x128xf32>, i32 -> vector<2x128xf32>
    %103 = arith.addf %101, %102 : vector<2x128xf32>
    %cst_34 = arith.constant 0.001953125 : f32
    %104 = vector.broadcast %cst_34 : f32 to vector<2x128xf32>
    %105 = arith.mulf %103, %104 : vector<2x128xf32>
    %106 = vector.extract_strided_slice %105 {offsets = [0, 0], sizes = [1, 128], strides = [1, 1]} : vector<2x128xf32> to vector<1x128xf32>
    %107 = vector.extract_strided_slice %105 {offsets = [1, 0], sizes = [1, 128], strides = [1, 1]} : vector<2x128xf32> to vector<1x128xf32>
    %c0_35 = arith.constant 0 : index
    %c0_36 = arith.constant 0 : index
    %c0_37 = arith.constant 0 : index
    %108 = vector.load %arg5[%c0_35, %c0_36, %c0_37] : memref<4x1x128xf32, #tpu.memory_space<vmem>>, vector<1x1x128xf32>
    %109 = vector.shape_cast %108 : vector<1x1x128xf32> to vector<1x128xf32>
    %110 = arith.mulf %106, %106 : vector<1x128xf32>
    %111 = arith.subf %107, %110 : vector<1x128xf32>
    %cst_38 = arith.constant 9.99999974E-6 : f32
    %112 = vector.broadcast %cst_38 : f32 to vector<1x128xf32>
    %113 = arith.addf %111, %112 : vector<1x128xf32>
    %114 = math.rsqrt %113 : vector<1x128xf32>
    %115 = arith.mulf %109, %114 : vector<1x128xf32>
    %c0_39 = arith.constant 0 : index
    %c0_40 = arith.constant 0 : index
    %c0_41 = arith.constant 0 : index
    %116 = vector.load %arg6[%c0_39, %c0_40, %c0_41] : memref<4x1x128xf32, #tpu.memory_space<vmem>>, vector<1x1x128xf32>
    %117 = vector.shape_cast %116 : vector<1x1x128xf32> to vector<1x128xf32>
    %118 = arith.mulf %106, %115 : vector<1x128xf32>
    %119 = arith.subf %117, %118 : vector<1x128xf32>
    %120 = vector.broadcast %115 : vector<1x128xf32> to vector<32x128xf32>
    %121 = arith.mulf %89, %120 : vector<32x128xf32>
    %122 = arith.addf %0, %121 : vector<32x128xf32>
    %123 = vector.broadcast %119 : vector<1x128xf32> to vector<32x128xf32>
    %124 = arith.addf %122, %123 : vector<32x128xf32>
    %cst_42 = arith.constant 0.000000e+00 : f32
    %125 = vector.broadcast %cst_42 : f32 to vector<32x128xf32>
    %126 = arith.cmpf oge, %124, %125 : vector<32x128xf32>
    %cst_43 = arith.constant 0.00999999977 : f32
    %127 = vector.broadcast %cst_43 : f32 to vector<32x128xf32>
    %128 = arith.mulf %127, %124 : vector<32x128xf32>
    %129 = arith.select %126, %124, %128 : vector<32x128xi1>, vector<32x128xf32>
    %130 = vector.extract_strided_slice %129 {offsets = [0, 0], sizes = [31, 128], strides = [1, 1]} : vector<32x128xf32> to vector<31x128xf32>
    %131 = tpu.concatenate %30, %130 in 0 : vector<1x128xf32>, vector<31x128xf32> -> vector<32x128xf32>
    %132 = arith.mulf %131, %23 : vector<32x128xf32>
    %133 = vector.extract_strided_slice %129 {offsets = [1, 0], sizes = [31, 128], strides = [1, 1]} : vector<32x128xf32> to vector<31x128xf32>
    %134 = tpu.concatenate %133, %30 in 0 : vector<31x128xf32>, vector<1x128xf32> -> vector<32x128xf32>
    %135 = arith.mulf %134, %29 : vector<32x128xf32>
    %136 = tpu.concatenate %132, %129, %135 in 1 : vector<32x128xf32>, vector<32x128xf32>, vector<32x128xf32> -> vector<32x384xf32>
    %137 = arith.truncf %136 : vector<32x384xf32> to vector<32x384xbf16>
    %c1 = arith.constant 1 : index
    %c0_44 = arith.constant 0 : index
    %c0_45 = arith.constant 0 : index
    %138 = vector.load %arg1[%c1, %c0_44, %c0_45] : memref<4x384x128xbf16, #tpu.memory_space<vmem>>, vector<1x384x128xbf16>
    %139 = vector.shape_cast %138 : vector<1x384x128xbf16> to vector<384x128xbf16>
    %cst_46 = arith.constant dense<0.000000e+00> : vector<32x128xf32>
    %140 = tpu.matmul %137, %139, %cst_46 {dimension_numbers = #tpu.dot_dimension_numbers<[1], [0], [0], [1], [0, 0, 1, 1], [], []>} : vector<32x384xbf16>, vector<384x128xbf16>, vector<32x128xf32> -> vector<32x128xf32>
    %cst_47 = arith.constant dense<0.000000e+00> : vector<128xf32>
    %141 = vector.multi_reduction <add>, %140, %cst_47 [0] : vector<32x128xf32> to vector<128xf32>
    %142 = vector.shape_cast %141 : vector<128xf32> to vector<1x128xf32>
    %143 = arith.mulf %140, %140 : vector<32x128xf32>
    %cst_48 = arith.constant dense<0.000000e+00> : vector<128xf32>
    %144 = vector.multi_reduction <add>, %143, %cst_48 [0] : vector<32x128xf32> to vector<128xf32>
    %145 = vector.shape_cast %144 : vector<128xf32> to vector<1x128xf32>
    %146 = tpu.concatenate %142, %145 in 0 : vector<1x128xf32>, vector<1x128xf32> -> vector<2x128xf32>
    %c8_i32_49 = arith.constant 8 : i32
    %147 = tpu.dynamic_rotate %146 by %c8_i32_49 dim 1 : vector<2x128xf32>, i32 -> vector<2x128xf32>
    %148 = arith.addf %146, %147 : vector<2x128xf32>
    %c16_i32_50 = arith.constant 16 : i32
    %149 = tpu.dynamic_rotate %148 by %c16_i32_50 dim 1 : vector<2x128xf32>, i32 -> vector<2x128xf32>
    %150 = arith.addf %148, %149 : vector<2x128xf32>
    %c32_i32_51 = arith.constant 32 : i32
    %151 = tpu.dynamic_rotate %150 by %c32_i32_51 dim 1 : vector<2x128xf32>, i32 -> vector<2x128xf32>
    %152 = arith.addf %150, %151 : vector<2x128xf32>
    %c64_i32_52 = arith.constant 64 : i32
    %153 = tpu.dynamic_rotate %152 by %c64_i32_52 dim 1 : vector<2x128xf32>, i32 -> vector<2x128xf32>
    %154 = arith.addf %152, %153 : vector<2x128xf32>
    %cst_53 = arith.constant 0.001953125 : f32
    %155 = vector.broadcast %cst_53 : f32 to vector<2x128xf32>
    %156 = arith.mulf %154, %155 : vector<2x128xf32>
    %157 = vector.extract_strided_slice %156 {offsets = [0, 0], sizes = [1, 128], strides = [1, 1]} : vector<2x128xf32> to vector<1x128xf32>
    %158 = vector.extract_strided_slice %156 {offsets = [1, 0], sizes = [1, 128], strides = [1, 1]} : vector<2x128xf32> to vector<1x128xf32>
    %c1_54 = arith.constant 1 : index
    %c0_55 = arith.constant 0 : index
    %c0_56 = arith.constant 0 : index
    %159 = vector.load %arg2[%c1_54, %c0_55, %c0_56] : memref<4x1x128xf32, #tpu.memory_space<vmem>>, vector<1x1x128xf32>
    %160 = vector.shape_cast %159 : vector<1x1x128xf32> to vector<1x128xf32>
    %161 = arith.mulf %157, %157 : vector<1x128xf32>
    %162 = arith.subf %158, %161 : vector<1x128xf32>
    %cst_57 = arith.constant 9.99999974E-6 : f32
    %163 = vector.broadcast %cst_57 : f32 to vector<1x128xf32>
    %164 = arith.addf %162, %163 : vector<1x128xf32>
    %165 = math.rsqrt %164 : vector<1x128xf32>
    %166 = arith.mulf %160, %165 : vector<1x128xf32>
    %c1_58 = arith.constant 1 : index
    %c0_59 = arith.constant 0 : index
    %c0_60 = arith.constant 0 : index
    %167 = vector.load %arg3[%c1_58, %c0_59, %c0_60] : memref<4x1x128xf32, #tpu.memory_space<vmem>>, vector<1x1x128xf32>
    %168 = vector.shape_cast %167 : vector<1x1x128xf32> to vector<1x128xf32>
    %169 = arith.mulf %157, %166 : vector<1x128xf32>
    %170 = arith.subf %168, %169 : vector<1x128xf32>
    %171 = vector.broadcast %166 : vector<1x128xf32> to vector<32x128xf32>
    %172 = arith.mulf %140, %171 : vector<32x128xf32>
    %173 = vector.broadcast %170 : vector<1x128xf32> to vector<32x128xf32>
    %174 = arith.addf %172, %173 : vector<32x128xf32>
    %cst_61 = arith.constant 0.000000e+00 : f32
    %175 = vector.broadcast %cst_61 : f32 to vector<32x128xf32>
    %176 = arith.cmpf oge, %174, %175 : vector<32x128xf32>
    %cst_62 = arith.constant 0.00999999977 : f32
    %177 = vector.broadcast %cst_62 : f32 to vector<32x128xf32>
    %178 = arith.mulf %177, %174 : vector<32x128xf32>
    %179 = arith.select %176, %174, %178 : vector<32x128xi1>, vector<32x128xf32>
    %180 = arith.truncf %179 : vector<32x128xf32> to vector<32x128xbf16>
    %c1_63 = arith.constant 1 : index
    %c0_64 = arith.constant 0 : index
    %c0_65 = arith.constant 0 : index
    %181 = vector.load %arg4[%c1_63, %c0_64, %c0_65] : memref<4x128x128xbf16, #tpu.memory_space<vmem>>, vector<1x128x128xbf16>
    %182 = vector.shape_cast %181 : vector<1x128x128xbf16> to vector<128x128xbf16>
    %cst_66 = arith.constant dense<0.000000e+00> : vector<32x128xf32>
    %183 = tpu.matmul %180, %182, %cst_66 {dimension_numbers = #tpu.dot_dimension_numbers<[1], [0], [0], [1], [0, 0, 1, 1], [], []>} : vector<32x128xbf16>, vector<128x128xbf16>, vector<32x128xf32> -> vector<32x128xf32>
    %cst_67 = arith.constant dense<0.000000e+00> : vector<128xf32>
    %184 = vector.multi_reduction <add>, %183, %cst_67 [0] : vector<32x128xf32> to vector<128xf32>
    %185 = vector.shape_cast %184 : vector<128xf32> to vector<1x128xf32>
    %186 = arith.mulf %183, %183 : vector<32x128xf32>
    %cst_68 = arith.constant dense<0.000000e+00> : vector<128xf32>
    %187 = vector.multi_reduction <add>, %186, %cst_68 [0] : vector<32x128xf32> to vector<128xf32>
    %188 = vector.shape_cast %187 : vector<128xf32> to vector<1x128xf32>
    %189 = tpu.concatenate %185, %188 in 0 : vector<1x128xf32>, vector<1x128xf32> -> vector<2x128xf32>
    %c8_i32_69 = arith.constant 8 : i32
    %190 = tpu.dynamic_rotate %189 by %c8_i32_69 dim 1 : vector<2x128xf32>, i32 -> vector<2x128xf32>
    %191 = arith.addf %189, %190 : vector<2x128xf32>
    %c16_i32_70 = arith.constant 16 : i32
    %192 = tpu.dynamic_rotate %191 by %c16_i32_70 dim 1 : vector<2x128xf32>, i32 -> vector<2x128xf32>
    %193 = arith.addf %191, %192 : vector<2x128xf32>
    %c32_i32_71 = arith.constant 32 : i32
    %194 = tpu.dynamic_rotate %193 by %c32_i32_71 dim 1 : vector<2x128xf32>, i32 -> vector<2x128xf32>
    %195 = arith.addf %193, %194 : vector<2x128xf32>
    %c64_i32_72 = arith.constant 64 : i32
    %196 = tpu.dynamic_rotate %195 by %c64_i32_72 dim 1 : vector<2x128xf32>, i32 -> vector<2x128xf32>
    %197 = arith.addf %195, %196 : vector<2x128xf32>
    %cst_73 = arith.constant 0.001953125 : f32
    %198 = vector.broadcast %cst_73 : f32 to vector<2x128xf32>
    %199 = arith.mulf %197, %198 : vector<2x128xf32>
    %200 = vector.extract_strided_slice %199 {offsets = [0, 0], sizes = [1, 128], strides = [1, 1]} : vector<2x128xf32> to vector<1x128xf32>
    %201 = vector.extract_strided_slice %199 {offsets = [1, 0], sizes = [1, 128], strides = [1, 1]} : vector<2x128xf32> to vector<1x128xf32>
    %c1_74 = arith.constant 1 : index
    %c0_75 = arith.constant 0 : index
    %c0_76 = arith.constant 0 : index
    %202 = vector.load %arg5[%c1_74, %c0_75, %c0_76] : memref<4x1x128xf32, #tpu.memory_space<vmem>>, vector<1x1x128xf32>
    %203 = vector.shape_cast %202 : vector<1x1x128xf32> to vector<1x128xf32>
    %204 = arith.mulf %200, %200 : vector<1x128xf32>
    %205 = arith.subf %201, %204 : vector<1x128xf32>
    %cst_77 = arith.constant 9.99999974E-6 : f32
    %206 = vector.broadcast %cst_77 : f32 to vector<1x128xf32>
    %207 = arith.addf %205, %206 : vector<1x128xf32>
    %208 = math.rsqrt %207 : vector<1x128xf32>
    %209 = arith.mulf %203, %208 : vector<1x128xf32>
    %c1_78 = arith.constant 1 : index
    %c0_79 = arith.constant 0 : index
    %c0_80 = arith.constant 0 : index
    %210 = vector.load %arg6[%c1_78, %c0_79, %c0_80] : memref<4x1x128xf32, #tpu.memory_space<vmem>>, vector<1x1x128xf32>
    %211 = vector.shape_cast %210 : vector<1x1x128xf32> to vector<1x128xf32>
    %212 = arith.mulf %200, %209 : vector<1x128xf32>
    %213 = arith.subf %211, %212 : vector<1x128xf32>
    %214 = vector.broadcast %209 : vector<1x128xf32> to vector<32x128xf32>
    %215 = arith.mulf %183, %214 : vector<32x128xf32>
    %216 = arith.addf %124, %215 : vector<32x128xf32>
    %217 = vector.broadcast %213 : vector<1x128xf32> to vector<32x128xf32>
    %218 = arith.addf %216, %217 : vector<32x128xf32>
    %cst_81 = arith.constant 0.000000e+00 : f32
    %219 = vector.broadcast %cst_81 : f32 to vector<32x128xf32>
    %220 = arith.cmpf oge, %218, %219 : vector<32x128xf32>
    %cst_82 = arith.constant 0.00999999977 : f32
    %221 = vector.broadcast %cst_82 : f32 to vector<32x128xf32>
    %222 = arith.mulf %221, %218 : vector<32x128xf32>
    %223 = arith.select %220, %218, %222 : vector<32x128xi1>, vector<32x128xf32>
    %224 = vector.extract_strided_slice %223 {offsets = [0, 0], sizes = [31, 128], strides = [1, 1]} : vector<32x128xf32> to vector<31x128xf32>
    %225 = tpu.concatenate %30, %224 in 0 : vector<1x128xf32>, vector<31x128xf32> -> vector<32x128xf32>
    %226 = arith.mulf %225, %23 : vector<32x128xf32>
    %227 = vector.extract_strided_slice %223 {offsets = [1, 0], sizes = [31, 128], strides = [1, 1]} : vector<32x128xf32> to vector<31x128xf32>
    %228 = tpu.concatenate %227, %30 in 0 : vector<31x128xf32>, vector<1x128xf32> -> vector<32x128xf32>
    %229 = arith.mulf %228, %29 : vector<32x128xf32>
    %230 = tpu.concatenate %226, %223, %229 in 1 : vector<32x128xf32>, vector<32x128xf32>, vector<32x128xf32> -> vector<32x384xf32>
    %231 = arith.truncf %230 : vector<32x384xf32> to vector<32x384xbf16>
    %c2 = arith.constant 2 : index
    %c0_83 = arith.constant 0 : index
    %c0_84 = arith.constant 0 : index
    %232 = vector.load %arg1[%c2, %c0_83, %c0_84] : memref<4x384x128xbf16, #tpu.memory_space<vmem>>, vector<1x384x128xbf16>
    %233 = vector.shape_cast %232 : vector<1x384x128xbf16> to vector<384x128xbf16>
    %cst_85 = arith.constant dense<0.000000e+00> : vector<32x128xf32>
    %234 = tpu.matmul %231, %233, %cst_85 {dimension_numbers = #tpu.dot_dimension_numbers<[1], [0], [0], [1], [0, 0, 1, 1], [], []>} : vector<32x384xbf16>, vector<384x128xbf16>, vector<32x128xf32> -> vector<32x128xf32>
    %cst_86 = arith.constant dense<0.000000e+00> : vector<128xf32>
    %235 = vector.multi_reduction <add>, %234, %cst_86 [0] : vector<32x128xf32> to vector<128xf32>
    %236 = vector.shape_cast %235 : vector<128xf32> to vector<1x128xf32>
    %237 = arith.mulf %234, %234 : vector<32x128xf32>
    %cst_87 = arith.constant dense<0.000000e+00> : vector<128xf32>
    %238 = vector.multi_reduction <add>, %237, %cst_87 [0] : vector<32x128xf32> to vector<128xf32>
    %239 = vector.shape_cast %238 : vector<128xf32> to vector<1x128xf32>
    %240 = tpu.concatenate %236, %239 in 0 : vector<1x128xf32>, vector<1x128xf32> -> vector<2x128xf32>
    %c8_i32_88 = arith.constant 8 : i32
    %241 = tpu.dynamic_rotate %240 by %c8_i32_88 dim 1 : vector<2x128xf32>, i32 -> vector<2x128xf32>
    %242 = arith.addf %240, %241 : vector<2x128xf32>
    %c16_i32_89 = arith.constant 16 : i32
    %243 = tpu.dynamic_rotate %242 by %c16_i32_89 dim 1 : vector<2x128xf32>, i32 -> vector<2x128xf32>
    %244 = arith.addf %242, %243 : vector<2x128xf32>
    %c32_i32_90 = arith.constant 32 : i32
    %245 = tpu.dynamic_rotate %244 by %c32_i32_90 dim 1 : vector<2x128xf32>, i32 -> vector<2x128xf32>
    %246 = arith.addf %244, %245 : vector<2x128xf32>
    %c64_i32_91 = arith.constant 64 : i32
    %247 = tpu.dynamic_rotate %246 by %c64_i32_91 dim 1 : vector<2x128xf32>, i32 -> vector<2x128xf32>
    %248 = arith.addf %246, %247 : vector<2x128xf32>
    %cst_92 = arith.constant 0.001953125 : f32
    %249 = vector.broadcast %cst_92 : f32 to vector<2x128xf32>
    %250 = arith.mulf %248, %249 : vector<2x128xf32>
    %251 = vector.extract_strided_slice %250 {offsets = [0, 0], sizes = [1, 128], strides = [1, 1]} : vector<2x128xf32> to vector<1x128xf32>
    %252 = vector.extract_strided_slice %250 {offsets = [1, 0], sizes = [1, 128], strides = [1, 1]} : vector<2x128xf32> to vector<1x128xf32>
    %c2_93 = arith.constant 2 : index
    %c0_94 = arith.constant 0 : index
    %c0_95 = arith.constant 0 : index
    %253 = vector.load %arg2[%c2_93, %c0_94, %c0_95] : memref<4x1x128xf32, #tpu.memory_space<vmem>>, vector<1x1x128xf32>
    %254 = vector.shape_cast %253 : vector<1x1x128xf32> to vector<1x128xf32>
    %255 = arith.mulf %251, %251 : vector<1x128xf32>
    %256 = arith.subf %252, %255 : vector<1x128xf32>
    %cst_96 = arith.constant 9.99999974E-6 : f32
    %257 = vector.broadcast %cst_96 : f32 to vector<1x128xf32>
    %258 = arith.addf %256, %257 : vector<1x128xf32>
    %259 = math.rsqrt %258 : vector<1x128xf32>
    %260 = arith.mulf %254, %259 : vector<1x128xf32>
    %c2_97 = arith.constant 2 : index
    %c0_98 = arith.constant 0 : index
    %c0_99 = arith.constant 0 : index
    %261 = vector.load %arg3[%c2_97, %c0_98, %c0_99] : memref<4x1x128xf32, #tpu.memory_space<vmem>>, vector<1x1x128xf32>
    %262 = vector.shape_cast %261 : vector<1x1x128xf32> to vector<1x128xf32>
    %263 = arith.mulf %251, %260 : vector<1x128xf32>
    %264 = arith.subf %262, %263 : vector<1x128xf32>
    %265 = vector.broadcast %260 : vector<1x128xf32> to vector<32x128xf32>
    %266 = arith.mulf %234, %265 : vector<32x128xf32>
    %267 = vector.broadcast %264 : vector<1x128xf32> to vector<32x128xf32>
    %268 = arith.addf %266, %267 : vector<32x128xf32>
    %cst_100 = arith.constant 0.000000e+00 : f32
    %269 = vector.broadcast %cst_100 : f32 to vector<32x128xf32>
    %270 = arith.cmpf oge, %268, %269 : vector<32x128xf32>
    %cst_101 = arith.constant 0.00999999977 : f32
    %271 = vector.broadcast %cst_101 : f32 to vector<32x128xf32>
    %272 = arith.mulf %271, %268 : vector<32x128xf32>
    %273 = arith.select %270, %268, %272 : vector<32x128xi1>, vector<32x128xf32>
    %274 = arith.truncf %273 : vector<32x128xf32> to vector<32x128xbf16>
    %c2_102 = arith.constant 2 : index
    %c0_103 = arith.constant 0 : index
    %c0_104 = arith.constant 0 : index
    %275 = vector.load %arg4[%c2_102, %c0_103, %c0_104] : memref<4x128x128xbf16, #tpu.memory_space<vmem>>, vector<1x128x128xbf16>
    %276 = vector.shape_cast %275 : vector<1x128x128xbf16> to vector<128x128xbf16>
    %cst_105 = arith.constant dense<0.000000e+00> : vector<32x128xf32>
    %277 = tpu.matmul %274, %276, %cst_105 {dimension_numbers = #tpu.dot_dimension_numbers<[1], [0], [0], [1], [0, 0, 1, 1], [], []>} : vector<32x128xbf16>, vector<128x128xbf16>, vector<32x128xf32> -> vector<32x128xf32>
    %cst_106 = arith.constant dense<0.000000e+00> : vector<128xf32>
    %278 = vector.multi_reduction <add>, %277, %cst_106 [0] : vector<32x128xf32> to vector<128xf32>
    %279 = vector.shape_cast %278 : vector<128xf32> to vector<1x128xf32>
    %280 = arith.mulf %277, %277 : vector<32x128xf32>
    %cst_107 = arith.constant dense<0.000000e+00> : vector<128xf32>
    %281 = vector.multi_reduction <add>, %280, %cst_107 [0] : vector<32x128xf32> to vector<128xf32>
    %282 = vector.shape_cast %281 : vector<128xf32> to vector<1x128xf32>
    %283 = tpu.concatenate %279, %282 in 0 : vector<1x128xf32>, vector<1x128xf32> -> vector<2x128xf32>
    %c8_i32_108 = arith.constant 8 : i32
    %284 = tpu.dynamic_rotate %283 by %c8_i32_108 dim 1 : vector<2x128xf32>, i32 -> vector<2x128xf32>
    %285 = arith.addf %283, %284 : vector<2x128xf32>
    %c16_i32_109 = arith.constant 16 : i32
    %286 = tpu.dynamic_rotate %285 by %c16_i32_109 dim 1 : vector<2x128xf32>, i32 -> vector<2x128xf32>
    %287 = arith.addf %285, %286 : vector<2x128xf32>
    %c32_i32_110 = arith.constant 32 : i32
    %288 = tpu.dynamic_rotate %287 by %c32_i32_110 dim 1 : vector<2x128xf32>, i32 -> vector<2x128xf32>
    %289 = arith.addf %287, %288 : vector<2x128xf32>
    %c64_i32_111 = arith.constant 64 : i32
    %290 = tpu.dynamic_rotate %289 by %c64_i32_111 dim 1 : vector<2x128xf32>, i32 -> vector<2x128xf32>
    %291 = arith.addf %289, %290 : vector<2x128xf32>
    %cst_112 = arith.constant 0.001953125 : f32
    %292 = vector.broadcast %cst_112 : f32 to vector<2x128xf32>
    %293 = arith.mulf %291, %292 : vector<2x128xf32>
    %294 = vector.extract_strided_slice %293 {offsets = [0, 0], sizes = [1, 128], strides = [1, 1]} : vector<2x128xf32> to vector<1x128xf32>
    %295 = vector.extract_strided_slice %293 {offsets = [1, 0], sizes = [1, 128], strides = [1, 1]} : vector<2x128xf32> to vector<1x128xf32>
    %c2_113 = arith.constant 2 : index
    %c0_114 = arith.constant 0 : index
    %c0_115 = arith.constant 0 : index
    %296 = vector.load %arg5[%c2_113, %c0_114, %c0_115] : memref<4x1x128xf32, #tpu.memory_space<vmem>>, vector<1x1x128xf32>
    %297 = vector.shape_cast %296 : vector<1x1x128xf32> to vector<1x128xf32>
    %298 = arith.mulf %294, %294 : vector<1x128xf32>
    %299 = arith.subf %295, %298 : vector<1x128xf32>
    %cst_116 = arith.constant 9.99999974E-6 : f32
    %300 = vector.broadcast %cst_116 : f32 to vector<1x128xf32>
    %301 = arith.addf %299, %300 : vector<1x128xf32>
    %302 = math.rsqrt %301 : vector<1x128xf32>
    %303 = arith.mulf %297, %302 : vector<1x128xf32>
    %c2_117 = arith.constant 2 : index
    %c0_118 = arith.constant 0 : index
    %c0_119 = arith.constant 0 : index
    %304 = vector.load %arg6[%c2_117, %c0_118, %c0_119] : memref<4x1x128xf32, #tpu.memory_space<vmem>>, vector<1x1x128xf32>
    %305 = vector.shape_cast %304 : vector<1x1x128xf32> to vector<1x128xf32>
    %306 = arith.mulf %294, %303 : vector<1x128xf32>
    %307 = arith.subf %305, %306 : vector<1x128xf32>
    %308 = vector.broadcast %303 : vector<1x128xf32> to vector<32x128xf32>
    %309 = arith.mulf %277, %308 : vector<32x128xf32>
    %310 = arith.addf %218, %309 : vector<32x128xf32>
    %311 = vector.broadcast %307 : vector<1x128xf32> to vector<32x128xf32>
    %312 = arith.addf %310, %311 : vector<32x128xf32>
    %cst_120 = arith.constant 0.000000e+00 : f32
    %313 = vector.broadcast %cst_120 : f32 to vector<32x128xf32>
    %314 = arith.cmpf oge, %312, %313 : vector<32x128xf32>
    %cst_121 = arith.constant 0.00999999977 : f32
    %315 = vector.broadcast %cst_121 : f32 to vector<32x128xf32>
    %316 = arith.mulf %315, %312 : vector<32x128xf32>
    %317 = arith.select %314, %312, %316 : vector<32x128xi1>, vector<32x128xf32>
    %318 = vector.extract_strided_slice %317 {offsets = [0, 0], sizes = [31, 128], strides = [1, 1]} : vector<32x128xf32> to vector<31x128xf32>
    %319 = tpu.concatenate %30, %318 in 0 : vector<1x128xf32>, vector<31x128xf32> -> vector<32x128xf32>
    %320 = arith.mulf %319, %23 : vector<32x128xf32>
    %321 = vector.extract_strided_slice %317 {offsets = [1, 0], sizes = [31, 128], strides = [1, 1]} : vector<32x128xf32> to vector<31x128xf32>
    %322 = tpu.concatenate %321, %30 in 0 : vector<31x128xf32>, vector<1x128xf32> -> vector<32x128xf32>
    %323 = arith.mulf %322, %29 : vector<32x128xf32>
    %324 = tpu.concatenate %320, %317, %323 in 1 : vector<32x128xf32>, vector<32x128xf32>, vector<32x128xf32> -> vector<32x384xf32>
    %325 = arith.truncf %324 : vector<32x384xf32> to vector<32x384xbf16>
    %c3 = arith.constant 3 : index
    %c0_122 = arith.constant 0 : index
    %c0_123 = arith.constant 0 : index
    %326 = vector.load %arg1[%c3, %c0_122, %c0_123] : memref<4x384x128xbf16, #tpu.memory_space<vmem>>, vector<1x384x128xbf16>
    %327 = vector.shape_cast %326 : vector<1x384x128xbf16> to vector<384x128xbf16>
    %cst_124 = arith.constant dense<0.000000e+00> : vector<32x128xf32>
    %328 = tpu.matmul %325, %327, %cst_124 {dimension_numbers = #tpu.dot_dimension_numbers<[1], [0], [0], [1], [0, 0, 1, 1], [], []>} : vector<32x384xbf16>, vector<384x128xbf16>, vector<32x128xf32> -> vector<32x128xf32>
    %cst_125 = arith.constant dense<0.000000e+00> : vector<128xf32>
    %329 = vector.multi_reduction <add>, %328, %cst_125 [0] : vector<32x128xf32> to vector<128xf32>
    %330 = vector.shape_cast %329 : vector<128xf32> to vector<1x128xf32>
    %331 = arith.mulf %328, %328 : vector<32x128xf32>
    %cst_126 = arith.constant dense<0.000000e+00> : vector<128xf32>
    %332 = vector.multi_reduction <add>, %331, %cst_126 [0] : vector<32x128xf32> to vector<128xf32>
    %333 = vector.shape_cast %332 : vector<128xf32> to vector<1x128xf32>
    %334 = tpu.concatenate %330, %333 in 0 : vector<1x128xf32>, vector<1x128xf32> -> vector<2x128xf32>
    %c8_i32_127 = arith.constant 8 : i32
    %335 = tpu.dynamic_rotate %334 by %c8_i32_127 dim 1 : vector<2x128xf32>, i32 -> vector<2x128xf32>
    %336 = arith.addf %334, %335 : vector<2x128xf32>
    %c16_i32_128 = arith.constant 16 : i32
    %337 = tpu.dynamic_rotate %336 by %c16_i32_128 dim 1 : vector<2x128xf32>, i32 -> vector<2x128xf32>
    %338 = arith.addf %336, %337 : vector<2x128xf32>
    %c32_i32_129 = arith.constant 32 : i32
    %339 = tpu.dynamic_rotate %338 by %c32_i32_129 dim 1 : vector<2x128xf32>, i32 -> vector<2x128xf32>
    %340 = arith.addf %338, %339 : vector<2x128xf32>
    %c64_i32_130 = arith.constant 64 : i32
    %341 = tpu.dynamic_rotate %340 by %c64_i32_130 dim 1 : vector<2x128xf32>, i32 -> vector<2x128xf32>
    %342 = arith.addf %340, %341 : vector<2x128xf32>
    %cst_131 = arith.constant 0.001953125 : f32
    %343 = vector.broadcast %cst_131 : f32 to vector<2x128xf32>
    %344 = arith.mulf %342, %343 : vector<2x128xf32>
    %345 = vector.extract_strided_slice %344 {offsets = [0, 0], sizes = [1, 128], strides = [1, 1]} : vector<2x128xf32> to vector<1x128xf32>
    %346 = vector.extract_strided_slice %344 {offsets = [1, 0], sizes = [1, 128], strides = [1, 1]} : vector<2x128xf32> to vector<1x128xf32>
    %c3_132 = arith.constant 3 : index
    %c0_133 = arith.constant 0 : index
    %c0_134 = arith.constant 0 : index
    %347 = vector.load %arg2[%c3_132, %c0_133, %c0_134] : memref<4x1x128xf32, #tpu.memory_space<vmem>>, vector<1x1x128xf32>
    %348 = vector.shape_cast %347 : vector<1x1x128xf32> to vector<1x128xf32>
    %349 = arith.mulf %345, %345 : vector<1x128xf32>
    %350 = arith.subf %346, %349 : vector<1x128xf32>
    %cst_135 = arith.constant 9.99999974E-6 : f32
    %351 = vector.broadcast %cst_135 : f32 to vector<1x128xf32>
    %352 = arith.addf %350, %351 : vector<1x128xf32>
    %353 = math.rsqrt %352 : vector<1x128xf32>
    %354 = arith.mulf %348, %353 : vector<1x128xf32>
    %c3_136 = arith.constant 3 : index
    %c0_137 = arith.constant 0 : index
    %c0_138 = arith.constant 0 : index
    %355 = vector.load %arg3[%c3_136, %c0_137, %c0_138] : memref<4x1x128xf32, #tpu.memory_space<vmem>>, vector<1x1x128xf32>
    %356 = vector.shape_cast %355 : vector<1x1x128xf32> to vector<1x128xf32>
    %357 = arith.mulf %345, %354 : vector<1x128xf32>
    %358 = arith.subf %356, %357 : vector<1x128xf32>
    %359 = vector.broadcast %354 : vector<1x128xf32> to vector<32x128xf32>
    %360 = arith.mulf %328, %359 : vector<32x128xf32>
    %361 = vector.broadcast %358 : vector<1x128xf32> to vector<32x128xf32>
    %362 = arith.addf %360, %361 : vector<32x128xf32>
    %cst_139 = arith.constant 0.000000e+00 : f32
    %363 = vector.broadcast %cst_139 : f32 to vector<32x128xf32>
    %364 = arith.cmpf oge, %362, %363 : vector<32x128xf32>
    %cst_140 = arith.constant 0.00999999977 : f32
    %365 = vector.broadcast %cst_140 : f32 to vector<32x128xf32>
    %366 = arith.mulf %365, %362 : vector<32x128xf32>
    %367 = arith.select %364, %362, %366 : vector<32x128xi1>, vector<32x128xf32>
    %368 = arith.truncf %367 : vector<32x128xf32> to vector<32x128xbf16>
    %c3_141 = arith.constant 3 : index
    %c0_142 = arith.constant 0 : index
    %c0_143 = arith.constant 0 : index
    %369 = vector.load %arg4[%c3_141, %c0_142, %c0_143] : memref<4x128x128xbf16, #tpu.memory_space<vmem>>, vector<1x128x128xbf16>
    %370 = vector.shape_cast %369 : vector<1x128x128xbf16> to vector<128x128xbf16>
    %cst_144 = arith.constant dense<0.000000e+00> : vector<32x128xf32>
    %371 = tpu.matmul %368, %370, %cst_144 {dimension_numbers = #tpu.dot_dimension_numbers<[1], [0], [0], [1], [0, 0, 1, 1], [], []>} : vector<32x128xbf16>, vector<128x128xbf16>, vector<32x128xf32> -> vector<32x128xf32>
    %cst_145 = arith.constant dense<0.000000e+00> : vector<128xf32>
    %372 = vector.multi_reduction <add>, %371, %cst_145 [0] : vector<32x128xf32> to vector<128xf32>
    %373 = vector.shape_cast %372 : vector<128xf32> to vector<1x128xf32>
    %374 = arith.mulf %371, %371 : vector<32x128xf32>
    %cst_146 = arith.constant dense<0.000000e+00> : vector<128xf32>
    %375 = vector.multi_reduction <add>, %374, %cst_146 [0] : vector<32x128xf32> to vector<128xf32>
    %376 = vector.shape_cast %375 : vector<128xf32> to vector<1x128xf32>
    %377 = tpu.concatenate %373, %376 in 0 : vector<1x128xf32>, vector<1x128xf32> -> vector<2x128xf32>
    %c8_i32_147 = arith.constant 8 : i32
    %378 = tpu.dynamic_rotate %377 by %c8_i32_147 dim 1 : vector<2x128xf32>, i32 -> vector<2x128xf32>
    %379 = arith.addf %377, %378 : vector<2x128xf32>
    %c16_i32_148 = arith.constant 16 : i32
    %380 = tpu.dynamic_rotate %379 by %c16_i32_148 dim 1 : vector<2x128xf32>, i32 -> vector<2x128xf32>
    %381 = arith.addf %379, %380 : vector<2x128xf32>
    %c32_i32_149 = arith.constant 32 : i32
    %382 = tpu.dynamic_rotate %381 by %c32_i32_149 dim 1 : vector<2x128xf32>, i32 -> vector<2x128xf32>
    %383 = arith.addf %381, %382 : vector<2x128xf32>
    %c64_i32_150 = arith.constant 64 : i32
    %384 = tpu.dynamic_rotate %383 by %c64_i32_150 dim 1 : vector<2x128xf32>, i32 -> vector<2x128xf32>
    %385 = arith.addf %383, %384 : vector<2x128xf32>
    %cst_151 = arith.constant 0.001953125 : f32
    %386 = vector.broadcast %cst_151 : f32 to vector<2x128xf32>
    %387 = arith.mulf %385, %386 : vector<2x128xf32>
    %388 = vector.extract_strided_slice %387 {offsets = [0, 0], sizes = [1, 128], strides = [1, 1]} : vector<2x128xf32> to vector<1x128xf32>
    %389 = vector.extract_strided_slice %387 {offsets = [1, 0], sizes = [1, 128], strides = [1, 1]} : vector<2x128xf32> to vector<1x128xf32>
    %c3_152 = arith.constant 3 : index
    %c0_153 = arith.constant 0 : index
    %c0_154 = arith.constant 0 : index
    %390 = vector.load %arg5[%c3_152, %c0_153, %c0_154] : memref<4x1x128xf32, #tpu.memory_space<vmem>>, vector<1x1x128xf32>
    %391 = vector.shape_cast %390 : vector<1x1x128xf32> to vector<1x128xf32>
    %392 = arith.mulf %388, %388 : vector<1x128xf32>
    %393 = arith.subf %389, %392 : vector<1x128xf32>
    %cst_155 = arith.constant 9.99999974E-6 : f32
    %394 = vector.broadcast %cst_155 : f32 to vector<1x128xf32>
    %395 = arith.addf %393, %394 : vector<1x128xf32>
    %396 = math.rsqrt %395 : vector<1x128xf32>
    %397 = arith.mulf %391, %396 : vector<1x128xf32>
    %c3_156 = arith.constant 3 : index
    %c0_157 = arith.constant 0 : index
    %c0_158 = arith.constant 0 : index
    %398 = vector.load %arg6[%c3_156, %c0_157, %c0_158] : memref<4x1x128xf32, #tpu.memory_space<vmem>>, vector<1x1x128xf32>
    %399 = vector.shape_cast %398 : vector<1x1x128xf32> to vector<1x128xf32>
    %400 = arith.mulf %388, %397 : vector<1x128xf32>
    %401 = arith.subf %399, %400 : vector<1x128xf32>
    %402 = vector.broadcast %397 : vector<1x128xf32> to vector<32x128xf32>
    %403 = arith.mulf %371, %402 : vector<32x128xf32>
    %404 = arith.addf %312, %403 : vector<32x128xf32>
    %405 = vector.broadcast %401 : vector<1x128xf32> to vector<32x128xf32>
    %406 = arith.addf %404, %405 : vector<32x128xf32>
    %cst_159 = arith.constant 0.000000e+00 : f32
    %407 = vector.broadcast %cst_159 : f32 to vector<32x128xf32>
    %408 = arith.cmpf oge, %406, %407 : vector<32x128xf32>
    %cst_160 = arith.constant 0.00999999977 : f32
    %409 = vector.broadcast %cst_160 : f32 to vector<32x128xf32>
    %410 = arith.mulf %409, %406 : vector<32x128xf32>
    %411 = arith.select %408, %406, %410 : vector<32x128xi1>, vector<32x128xf32>
    %c0_161 = arith.constant 0 : index
    %c0_162 = arith.constant 0 : index
    %412 = vector.load %arg7[%c0_161, %c0_162] : memref<32x128xf32, #tpu.memory_space<vmem>>, vector<32x128xf32>
    tpu.vector_store %arg7[%c0_161, %c0_162], %411 {strides = array<i32>} : memref<32x128xf32, #tpu.memory_space<vmem>>, vector<32x128xf32>,
    return
  }
}

</mosaic_0001>

<bundles_post_ra>
// kernel: _residual_stack_forward.1
= control target key start
LH: loop header
LB: loop body
LE: loop exit
PB: predicated region body
PF: predicated region fallthrough
CT: control target
= control target key end

     0   :  { %v31_v3 = vlaneseq  ;;  %vm124_vm1 = vcmask 1040384   ;;  %vm141_vm4 = vcmask 1046528   ;;  %v3569_v34 = vmov 0.0   ;;  %s3570_s11 = smov 8   ;;  %s3571_s12 = smov 16   ;;  %s4485_s1 = inlined_call_operand.vmem [shape: bf16[4,384,128], index: 1, kind: input, shape index: {}]   ;;  %s4486_s0 = inlined_call_operand.vmem [shape: f32[32,128], index: 0, kind: input, shape index: {}, may-alias: {0,7}]   ;;  %s4487_s4 = inlined_call_operand.vmem [shape: bf16[4,128,128], index: 4, kind: input, shape index: {}]   ;;  %s4488_s2 = inlined_call_operand.vmem [shape: f32[4,1,128], index: 2, kind: input, shape index: {}]   ;;  %s4489_s3 = inlined_call_operand.vmem [shape: f32[4,1,128], index: 3, kind: input, shape index: {}]   ;;  %s4490_s5 = inlined_call_operand.vmem [shape: f32[4,1,128], index: 5, kind: input, shape index: {}]   ;;  %s4491_s6 = inlined_call_operand.vmem [shape: f32[4,1,128], index: 6, kind: input, shape index: {}]   ;;  %s4492_s7 = inlined_call_operand.vmem [shape: f32[32,128], index: 7, kind: output, shape index: {}, may-alias: {0,7}]  }
   0x1   :  { %v3422_v0 = vld [vmem:[%s4485_s1 + $0x78] sm:$0xff]   ;;  %v3425_v4 = vld [vmem:[%s4485_s1 + $0x70] sm:$0xff]   ;;  %v3428_v7 = vld [vmem:[%s4485_s1 + $0x68] sm:$0xff]   ;;  %s3572_s13 = smov 32   ;;  %s3573_s14 = smov 64  }
   0x2   :  { %v3423_v1 = vld [vmem:[%s4485_s1 + $0xb8] sm:$0xff]   ;;  %3064 = vmatprep.subr.bf16.mxu0 %v3422_v0  ;;  %v3426_v5 = vld [vmem:[%s4485_s1 + $0xb0] sm:$0xff]   ;;  %v3636_v8 = vshrl.u32 %v31_v3, 7  ;;  %v3429_v9 = vld [vmem:[%s4485_s1 + $0xa8] sm:$0xff]  }
   0x3   :  { %v3424_v2 = vld [vmem:[%s4485_s1 + $0x38] sm:$0xff]   ;;  %3256 = vmatprep.subr.bf16.mxu1 %v3423_v1  ;;  %v3427_v6 = vld [vmem:[%s4485_s1 + $0x30] sm:$0xff]   ;;  %v3430_v10 = vld [vmem:[%s4485_s1 + $0x28] sm:$0xff]  }
   0x4   :  { %3065 = vmatpush3.bf16.msra.mxu0 %v3424_v2  ;;  %3257 = vmatpush3.bf16.msra.mxu1 %v3423_v1  ;;  %v3431_v11 = vld [vmem:[%s4485_s1 + $0x60] sm:$0xff]   ;;  %v33_v13 = vadd.s32 8, %v3636_v8  ;;  %v3434_v15 = vld [vmem:[%s4485_s1 + $0x58] sm:$0xff]   ;;  %v35_v17 = vadd.s32 24, %v3636_v8  ;;  %v40_v20 = vand.u32 15, %v3636_v8  ;;  %v3437_v21 = vld [vmem:[%s4485_s1 + $0x50] sm:$0xff]  }
   0x5   :  { %3066 = vmatprep.subr.bf16.mxu0 %v3425_v4  ;;  %3258 = vmatprep.subr.bf16.mxu1 %v3426_v5  ;;  %v3432_v12 = vld [vmem:[%s4485_s1 + $0xa0] sm:$0xff]   ;;  %v3435_v16 = vld [vmem:[%s4485_s1 + $0x98] sm:$0xff]   ;;  %v34_v22 = vadd.s32 16, %v3636_v8  ;;  %v3438_v23 = vld [vmem:[%s4485_s1 + $0x90] sm:$0xff]  }
   0x6   :  { %v3433_v14 = vld [vmem:[%s4485_s1 + $0x20] sm:$0xff]   ;;  %v47_v18 = vand.u32 15, %v33_v13  ;;  %v3436_v19 = vld [vmem:[%s4485_s1 + $0x18] sm:$0xff]   ;;  %v61_v24 = vand.u32 15, %v35_v17  ;;  %v3439_v26 = vld [vmem:[%s4485_s1 + $0x10] sm:$0xff]   ;;  %vm3679_vm2 = vcmp.gt.s32.totalorder %v40_v20, 0 }
   0x7   :  { %v3440_v28 = vld [vmem:[%s4485_s1 + $0x48] sm:$0xff]   ;;  %v54_v29 = vand.u32 15, %v34_v22  ;;  %v3443_v32 = vld [vmem:[%s4485_s1 + $0x40] sm:$0xff]   ;;  %v30_v38 = vld [vmem:[%s4486_s0 + $0x18] sm:$0xff]  ;;  %v3713_v39 = vsel %vm3679_vm2, 1.0, %v3569_v34 }
   0x8   :  { %3067 = vmatpush3.bf16.msra.mxu0 %v3427_v6  ;;  %3259 = vmatpush3.bf16.msra.mxu1 %v3426_v5  ;;  %vm3672_vm0 = vcmp.lt.s32.totalorder %v47_v18, 15  ;;  %v3441_v30 = vld [vmem:[%s4485_s1 + $0x88] sm:$0xff]   ;;  %vm99_vm3 = vcmp.lt.s32.totalorder %v61_v24, 15  ;;  %v3444_v33 = vld [vmem:[%s4485_s1 + $0x80] sm:$0xff]   ;;  %v3724_v44 = vld [vmem:[%s4486_s0 + $0x10] sm:$0xff]  ;;  %vm111_vm8 = vcmp.ge.f32.partialorder %v30_v38, 0.0 }
   0x9   :  { %3068 = vmatprep.subr.bf16.mxu0 %v3428_v7  ;;  %3260 = vmatprep.subr.bf16.mxu1 %v3429_v9  ;;  %v3442_v31 = vld [vmem:[%s4485_s1 + $0x8] sm:$0xff]   ;;  %v3700_v35 = vsel %vm3672_vm0, 1.0, %v3569_v34  ;;  %v27_v36 = vld [vmem:[%s4486_s0] sm:$0xff]  ;;  %v3715_v40 = vsel %vm99_vm3, 1.0, %v3569_v34  ;;  %vm3717_vm5 = vcmp.gt.s32.totalorder %v54_v29, 0  ;;  %vm110_vm9 = vcmp.ge.f32.partialorder %v3724_v44, 0.0 }
   0xa   :  { %v28_v37 = vld [vmem:[%s4486_s0 + $0x8] sm:$0xff]  ;;  %vm108_vm6 = vcmp.ge.f32.partialorder %v27_v36, 0.0  ;;  %v112_v42 = vmul.f32 0.01, %v27_v36  ;;  %v115_v45 = vmul.f32 0.01, %v30_v38 }
   0xb   :  { %vm109_vm7 = vcmp.ge.f32.partialorder %v28_v37, 0.0  ;;  %v113_v43 = vmul.f32 0.01, %v28_v37  ;;  %v3445_v46 = vld [vmem:[%s4485_s1] sm:$0xff]   ;;  %v114_v49 = vmul.f32 0.01, %v3724_v44 }
   0xc   :  { %3069 = vmatpush3.bf16.msra.mxu0 %v3430_v10  ;;  %3261 = vmatpush3.bf16.msra.mxu1 %v3429_v9  ;;  %v116_v47 = vsel %vm108_vm6, %v27_v36, %v112_v42  ;;  %v119_v56 = vsel %vm111_vm8, %v30_v38, %v115_v45  ;;  %v3739_v63 = vsel %vm3717_vm5, 1.0, %v3569_v34 }
   0xd   :  { %3070 = vmatprep.subr.bf16.mxu0 %v3431_v11  ;;  %3262 = vmatprep.subr.bf16.mxu1 %v3432_v12  ;;  %v117_v48 = vsel %vm109_vm7, %v28_v37, %v113_v43  ;;  %v125_v50 = vrot.slane %v116_v47, 7  ;;  %v142_v52 = vrot.slane %v116_v47, 1  ;;  %v118_v55 = vsel %vm110_vm9, %v3724_v44, %v114_v49 }
   0xe   :  { %v126_v51 = vrot.slane %v117_v48, 7  ;;  %v143_v53 = vrot.slane %v117_v48, 1  ;;  %v159_v54 = vpack.c.bf16 %v117_v48, %v116_v47  ;;  %v145_v58 = vrot.slane %v118_v55, 1 }
   0xf   :  { %v136_v57 = vsel %vm124_vm1, 0.0, %v125_v50  ;;  %v147_v62 = vrot.slane %v119_v56, 1  ;;  %v162_v1 = vpack.c.bf16 %v119_v56, %v118_v55  ;;  %v128_v2 = vrot.slane %v118_v55, 7 }
  0x10   :  { %3071 = vmatpush3.bf16.msra.mxu0 %v3433_v14  ;;  %3263 = vmatpush3.bf16.msra.mxu1 %v3432_v12  ;;  %v127_v59 = vsel %vm124_vm1, %v125_v50, %v126_v51  ;;  %v144_v60 = vsel %vm141_vm4, %v142_v52, %v143_v53  ;;  %v137_v61 = vmul.f32 %v3713_v39, %v136_v57  ;;  %v130_v3 = vrot.slane %v119_v56, 7 }
  0x11   :  { %3072 = vmatprep.subr.bf16.mxu0 %v3434_v15  ;;  %3264 = vmatprep.subr.bf16.mxu1 %v3435_v16  ;;  %v146_v0 = vsel %vm141_vm4, %v143_v53, %v145_v58  ;;  %v148_v6 = vsel %vm141_vm4, %v145_v58, %v147_v62  ;;  %v153_v7 = vsel %vm141_vm4, %v147_v62, 0.0  ;;  %v129_v10 = vsel %vm124_vm1, %v126_v51, %v128_v2 }
  0x12   :  { %388 = vmatprep.mubr.bf16.mxu0 %v159_v54  ;;  %v155_v4 = vmul.f32 %v3700_v35, %v146_v0  ;;  %v158_v5 = vpack.c.bf16 %v127_v59, %v137_v61  ;;  %v157_v9 = vmul.f32 %v3715_v40, %v153_v7  ;;  %v139_v12 = vmul.f32 %v3739_v63, %v129_v10  ;;  %v3447_v7 = vld [vmem:[%s4487_s4 + $0x30] sm:$0xff]   ;;  %v3449_v10 = vld [vmem:[%s4487_s4 + $0x20] sm:$0xff]  }
  0x13   :  { %v131_v14 = vsel %vm124_vm1, %v128_v2, %v130_v3 }
  0x14   :  { %3073 = vmatpush3.bf16.msra.mxu0 %v3436_v19  ;;  %3265 = vmatpush3.bf16.msra.mxu1 %v3435_v16  ;;  %v160_v11 = vpack.c.bf16 %v155_v4, %v144_v60  ;;  %v163_v13 = vpack.c.bf16 %v157_v9, %v148_v6  ;;  %v161_v15 = vpack.c.bf16 %v131_v14, %v139_v12  ;;  %v3446_v6 = vld [vmem:[%s4487_s4 + $0x38] sm:$0xff]   ;;  %v3448_v9 = vld [vmem:[%s4487_s4 + $0x28] sm:$0xff]   ;;  %v3451_v12 = vld [vmem:[%s4487_s4 + $0x10] sm:$0xff]  }
  0x15   :  { %3074 = vmatprep.subr.bf16.mxu0 %v3437_v21  ;;  %3266 = vmatprep.subr.bf16.mxu1 %v3438_v23  ;;  %v3453_v14 = vld [vmem:[%s4487_s4] sm:$0xff]  }
  0x16   :  { %3272 = vmatprep.mubr.bf16.mxu1 %v160_v11  ;;  %v3450_v11 = vld [vmem:[%s4487_s4 + $0x18] sm:$0xff]  }
  0x18   :  { %3075 = vmatpush3.bf16.msra.mxu0 %v3439_v26  ;;  %3267 = vmatpush3.bf16.msra.mxu1 %v3438_v23 }
  0x19   :  { %3076 = vmatprep.subr.bf16.mxu0 %v3440_v28  ;;  %3268 = vmatprep.subr.bf16.mxu1 %v3441_v30 }
  0x1c   :  { %3077 = vmatpush3.bf16.msra.mxu0 %v3442_v31  ;;  %3269 = vmatpush3.bf16.msra.mxu1 %v3441_v30 }
  0x1d   :  { %3078 = vmatprep.subr.bf16.mxu0 %v3443_v32  ;;  %3270 = vmatprep.subr.bf16.mxu1 %v3444_v33 }
  0x20   :  { %3079 = vmatpush3.bf16.msra.mxu0 %v3445_v46  ;;  %3271 = vmatpush3.bf16.msra.mxu1 %v3444_v33 }
  0x21   :  { %3276 = vmatprep.subr.bf16.mxu0 %v3446_v6 }
  0x23   :  { %389 = vmatmul.mubr.bf16.vlgmr.msra.gmra.mxu0 %v158_v5  ;;  %3273 = vmatmul.mubr.bf16.vlgmr.msra.gmra.mxu1 %v163_v13  ;;  %v3452_v13 = vld [vmem:[%s4487_s4 + $0x8] sm:$0xff]  }
  0x24   :  { %396 = vmatprep.mubr.bf16.mxu0 %v162_v1  ;;  %3277 = vmatpush3.bf16.msra.mxu0 %v3446_v6 }
  0x25   :  { %3278 = vmatprep.subr.bf16.mxu0 %v3447_v7 }
  0x28   :  { %3279 = vmatpush3.bf16.msra.mxu0 %v3447_v7 }
  0x29   :  { %3280 = vmatprep.subr.bf16.mxu0 %v3448_v9 }
  0x2b   :  { %397 = vmatmul.mubr.bf16.gmra.mxu0 %v161_v15 }
  0x2c   :  { %3281 = vmatpush3.bf16.msra.mxu0 %v3448_v9 }
  0x2d   :  { %3282 = vmatprep.subr.bf16.mxu0 %v3449_v10 }
  0x30   :  { %3283 = vmatpush3.bf16.msra.mxu0 %v3449_v10 }
  0x31   :  { %3284 = vmatprep.subr.bf16.mxu0 %v3450_v11 }
  0x34   :  { %3285 = vmatpush3.bf16.msra.mxu0 %v3450_v11 }
  0x35   :  { %3286 = vmatprep.subr.bf16.mxu0 %v3451_v12 }
  0x38   :  { %3287 = vmatpush3.bf16.msra.mxu0 %v3451_v12 }
  0x39   :  { %3288 = vmatprep.subr.bf16.mxu0 %v3452_v13 }
  0x3c   :  { %3289 = vmatpush3.bf16.msra.mxu0 %v3452_v13 }
  0x3d   :  { %3290 = vmatprep.subr.bf16.mxu0 %v3453_v14 }
  0x40   :  { %3291 = vmatpush3.bf16.msra.mxu0 %v3453_v14 }
  0xe3   :  { %v3080_v16 = vpop.f32.mrf.mxu0  ;;  %v3274_v18 = vpop.f32.mrf.mxu1 }
  0xe5   :  { %v3081_v17 = vpop.f32.mrf.mxu0  ;;  %v439_v20 = vpop.f32.mrf.mxu1 }
  0xe6   :  { %v3082_v22 = vadd.f32 %v3081_v17, %v3080_v16 }
  0xe7   :  { %v3083_v19 = vpop.f32.mrf.mxu0  ;;  %v3275_v23 = vpop.f32.mrf.mxu1 }
  0xe8   :  { %v3751_v29 = vadd.f32 %v3082_v22, %v439_v20  ;;  %v3574_v22 = vmov 1966171168  }
  0xe9   :  { %v3084_v21 = vpop.f32.mrf.mxu0  ;;  %v442_v26 = vpop.f32.mrf.mxu1 }
  0xea   :  { %v3085_v24 = vadd.f32 %v3084_v21, %v3083_v19  ;;  %v463_v36 = vmul.f32 %v3751_v29, %v3751_v29 }
  0xeb   :  { %v3086_v25 = vpop.f32.mrf.mxu0 }
  0xec   :  { %v3749_v27 = vadd.f32 %v3085_v24, %v442_v26 }
  0xed   :  { %v3087_v28 = vpop.f32.mrf.mxu0 }
  0xee   :  { %v3088_v30 = vadd.f32 %v3087_v28, %v3086_v25  ;;  %v464_v32 = vmul.f32 %v3749_v27, %v3749_v27  ;;  %v454_v37 = vadd.f32 %v3749_v27, %v3751_v29 }
  0xef   :  { %v3089_v31 = vpop.f32.mrf.mxu0 }
  0xf0   :  { %v3755_v33 = vadd.f32 %v3274_v18, %v3088_v30  ;;  %v467_v42 = vadd.f32 %v464_v32, %v463_v36  ;;  %v3806_v32 = vsub.s32 0, %v3636_v8 }
  0xf1   :  { %v3090_v34 = vpop.f32.mrf.mxu0 }
  0xf2   :  { %v465_v38 = vmul.f32 %v3755_v33, %v3755_v33  ;;  %v3091_v41 = vadd.f32 %v3090_v34, %v3089_v31  ;;  %v455_v43 = vadd.f32 %v454_v37, %v3755_v33  ;;  %v490_v31 = vld [vmem:[%s4488_s2] sm:$0x1] }
  0xf3   :  { %v516_v37 = vld [vmem:[%s4489_s3] sm:$0x1] }
  0xf4   :  { %v3764_v45 = vadd.f32 %v3275_v23, %v3091_v41  ;;  %v468_v46 = vadd.f32 %v467_v42, %v465_v38  ;;  %v500_v23 = vunpack.c.l.s4 %v3574_v22 }
  0xf6   :  { %v456_v47 = vadd.f32 %v455_v43, %v3764_v45  ;;  %v466_v48 = vmul.f32 %v3764_v45, %v3764_v45  ;;  %v501_v24 = vunpack.c.0.s8 %v500_v23 }
  0xf8   :  { %v457_v49 = vrot.slane %v456_v47, 4  ;;  %v469_v50 = vadd.f32 %v468_v46, %v466_v48  ;;  %v3799_v25 = vsub.s32 %v501_v24, %v3636_v8 }
  0xfa   :  { %v458_v51 = vadd.f32 %v457_v49, %v456_v47  ;;  %v470_v52 = vrot.slane %v469_v50, 4 }
  0xfc   :  { %v459_v53 = vrot.slane %v458_v51, 2  ;;  %v471_v54 = vadd.f32 %v470_v52, %v469_v50 }
  0xfe   :  { %v460_v55 = vadd.f32 %v459_v53, %v458_v51  ;;  %v472_v56 = vrot.slane %v471_v54, 2 }
 0x100   :  { %v461_v57 = vrot.slane %v460_v55, 1  ;;  %v473_v58 = vadd.f32 %v472_v56, %v471_v54 }
 0x102   :  { %v474_v59 = vrot.slane %v473_v58, 1  ;;  %v462_v60 = vadd.f32 %v461_v57, %v460_v55 }
 0x104   :  { %v475_v61 = vadd.f32 %v474_v59, %v473_v58 }
 0x106   :  { %v476_v62 = vsel %vm124_vm1, %v462_v60, %v475_v61 }
 0x107   :  { %477 = vrot.lane.b32.xlu0 %v476_v62, %s3570_s11 }
 0x179   :  { %v478_v0 = vpop.permute.xlu0 %477 }
 0x17a   :  { %v479_v1 = vadd.f32 %v478_v0, %v476_v62 }
 0x17c   :  { %480 = vrot.lane.b32.xlu0 %v479_v1, %s3571_s12 }
 0x1ee   :  { %v481_v2 = vpop.permute.xlu0 %480 }
 0x1ef   :  { %v482_v3 = vadd.f32 %v481_v2, %v479_v1 }
 0x1f1   :  { %483 = vrot.lane.b32.xlu1 %v482_v3, %s3572_s13 }
 0x263   :  { %v484_v4 = vpop.permute.xlu1 %483 }
 0x264   :  { %v485_v5 = vadd.f32 %v484_v4, %v482_v3 }
 0x266   :  { %486 = vrot.lane.b32.xlu1 %v485_v5, %s3573_s14 }
 0x2d8   :  { %v487_v15 = vpop.permute.xlu1 %486 }
 0x2d9   :  { %v488_v16 = vadd.f32 %v487_v15, %v485_v5 }
 0x2db   :  { %v489_v17 = vmul.f32 0.001953125, %v488_v16 }
 0x2dd   :  { %v491_v18 = vmul.f32 %v489_v17, %v489_v17 }
 0x2df   :  { %v493_v19 = vrot.slane %v491_v18, 7 }
 0x2e1   :  { %v495_v20 = vsub.f32 %v489_v17, %v493_v19 }
 0x2e3   :  { %v496_v21 = vadd.f32 1e-05, %v495_v20 }
 0x2e5   :  { %3550 = vrsqrt.f32 %v496_v21 }
 0x2f2   :  { %v3551_v26 = vpop.eup %3550 }
 0x2f3   :  { %v505_v28 = vrot.slane %v3551_v26, %v3799_v25 }
 0x2f5   :  { %v506_v30 = vcombine.high %v505_v28, %v505_v28 }
 0x2f7   :  { %v513_v34 = vrot.slane %v506_v30, %v3799_v25 }
 0x2f9   :  { %v515_v36 = vmul.f32 %v513_v34, %v490_v31 }
 0x2fb   :  { %v517_v38 = vmul.f32 %v515_v36, %v489_v17  ;;  %v523_v41 = vrot.slane %v515_v36, %v3806_v32  ;;  %v3454_v36 = vld [vmem:[%s4485_s1 + $0x138] sm:$0xff]  }
 0x2fc   :  { %3112 = vmatprep.subr.bf16.mxu1 %v3454_v36 }
 0x2fd   :  { %v518_v42 = vsub.f32 %v516_v37, %v517_v38  ;;  %v527_v43 = vmul.f32 %v523_v41, %v3755_v33  ;;  %v528_v46 = vmul.f32 %v523_v41, %v3764_v45  ;;  %v525_v8 = vmul.f32 %v523_v41, %v3751_v29  ;;  %v3455_v37 = vld [vmem:[%s4485_s1 + $0xf8] sm:$0xff]  }
 0x2fe   :  { %v526_v48 = vmul.f32 %v523_v41, %v3749_v27  ;;  %v3456_v38 = vld [vmem:[%s4485_s1 + $0x178] sm:$0xff]   ;;  %3113 = vmatpush3.bf16.msra.mxu1 %v3455_v37  ;;  %v3457_v41 = vld [vmem:[%s4485_s1 + $0x130] sm:$0xff]  }
 0x2ff   :  { %v533_v47 = vrot.slane %v518_v42, %v3806_v32  ;;  %3296 = vmatprep.subr.bf16.mxu0 %v3456_v38  ;;  %v3458_v42 = vld [vmem:[%s4485_s1 + $0xf0] sm:$0xff]   ;;  %3114 = vmatprep.subr.bf16.mxu1 %v3457_v41 }
 0x301   :  { %v535_v49 = vadd.f32 %v533_v47, %v525_v8  ;;  %v536_v50 = vadd.f32 %v533_v47, %v526_v48  ;;  %v537_v51 = vadd.f32 %v533_v47, %v527_v43  ;;  %v538_v52 = vadd.f32 %v533_v47, %v528_v46  ;;  %v3459_v43 = vld [vmem:[%s4485_s1 + $0x170] sm:$0xff]   ;;  %v3460_v46 = vld [vmem:[%s4485_s1 + $0x128] sm:$0xff]   ;;  %v3463_v48 = vld [vmem:[%s4485_s1 + $0x120] sm:$0xff]  }
 0x302   :  { %3115 = vmatpush3.bf16.msra.mxu1 %v3458_v42  ;;  %v3461_v47 = vld [vmem:[%s4485_s1 + $0xe8] sm:$0xff]  }
 0x303   :  { %vm539_vm10 = vcmp.ge.f32.partialorder %v535_v49, 0.0  ;;  %vm540_vm11 = vcmp.ge.f32.partialorder %v536_v50, 0.0  ;;  %v543_v53 = vmul.f32 0.01, %v535_v49  ;;  %v544_v54 = vmul.f32 0.01, %v536_v50  ;;  %3116 = vmatprep.subr.bf16.mxu1 %v3460_v46 }
 0x304   :  { %vm541_vm12 = vcmp.ge.f32.partialorder %v537_v51, 0.0  ;;  %vm542_vm13 = vcmp.ge.f32.partialorder %v538_v52, 0.0  ;;  %v545_v55 = vmul.f32 0.01, %v537_v51  ;;  %v546_v33 = vmul.f32 0.01, %v538_v52 }
 0x305   :  { %v547_v56 = vsel %vm539_vm10, %v535_v49, %v543_v53  ;;  %v548_v45 = vsel %vm540_vm11, %v536_v50, %v544_v54  ;;  %v3462_v8 = vld [vmem:[%s4485_s1 + $0x168] sm:$0xff]   ;;  %v3464_v49 = vld [vmem:[%s4485_s1 + $0xe0] sm:$0xff]   ;;  %v3468_v53 = vld [vmem:[%s4485_s1 + $0x158] sm:$0xff]  }
 0x306   :  { %v551_v57 = vpack.c.bf16 %v548_v45, %v547_v56  ;;  %v549_v58 = vsel %vm541_vm12, %v537_v51, %v545_v55  ;;  %v550_v59 = vsel %vm542_vm13, %v538_v52, %v546_v33  ;;  %3117 = vmatpush3.bf16.msra.mxu1 %v3461_v47  ;;  %v3465_v50 = vld [vmem:[%s4485_s1 + $0x160] sm:$0xff]   ;;  %v3466_v51 = vld [vmem:[%s4485_s1 + $0x118] sm:$0xff]   ;;  %v3469_v54 = vld [vmem:[%s4485_s1 + $0x110] sm:$0xff]  }
 0x307   :  { %v552_v29 = vpack.c.bf16 %v550_v59, %v549_v58  ;;  %3118 = vmatprep.subr.bf16.mxu1 %v3463_v48  ;;  %v3467_v52 = vld [vmem:[%s4485_s1 + $0xd8] sm:$0xff]   ;;  %v3470_v55 = vld [vmem:[%s4485_s1 + $0xd0] sm:$0xff]   ;;  %v3472_v56 = vld [vmem:[%s4485_s1 + $0x108] sm:$0xff]  }
 0x308   :  { %3292 = vmatprep.mubr.bf16.mxu0 %v551_v57  ;;  %v3471_v33 = vld [vmem:[%s4485_s1 + $0x150] sm:$0xff]   ;;  %v3474_v45 = vld [vmem:[%s4485_s1 + $0x148] sm:$0xff]   ;;  %v3475_v58 = vld [vmem:[%s4485_s1 + $0x100] sm:$0xff]  }
 0x309   :  { %3293 = vmatmul.mubr.bf16.vlgmr.msra.gmra.mxu0 %v552_v29  ;;  %v3473_v57 = vld [vmem:[%s4485_s1 + $0xc8] sm:$0xff]   ;;  %v3476_v59 = vld [vmem:[%s4485_s1 + $0xc0] sm:$0xff]  }
 0x30a   :  { %3297 = vmatpush3.bf16.msra.mxu0 %v3456_v38  ;;  %3119 = vmatpush3.bf16.msra.mxu1 %v3464_v49  ;;  %v3477_v29 = vld [vmem:[%s4485_s1 + $0x140] sm:$0xff]  }
 0x30b   :  { %3298 = vmatprep.subr.bf16.mxu0 %v3459_v43  ;;  %3120 = vmatprep.subr.bf16.mxu1 %v3466_v51 }
 0x30e   :  { %3299 = vmatpush3.bf16.msra.mxu0 %v3459_v43  ;;  %3121 = vmatpush3.bf16.msra.mxu1 %v3467_v52 }
 0x30f   :  { %3300 = vmatprep.subr.bf16.mxu0 %v3462_v8  ;;  %3122 = vmatprep.subr.bf16.mxu1 %v3469_v54 }
 0x312   :  { %3301 = vmatpush3.bf16.msra.mxu0 %v3462_v8  ;;  %3123 = vmatpush3.bf16.msra.mxu1 %v3470_v55 }
 0x313   :  { %3302 = vmatprep.subr.bf16.mxu0 %v3465_v50  ;;  %3124 = vmatprep.subr.bf16.mxu1 %v3472_v56 }
 0x316   :  { %3303 = vmatpush3.bf16.msra.mxu0 %v3465_v50  ;;  %3125 = vmatpush3.bf16.msra.mxu1 %v3473_v57 }
 0x317   :  { %3304 = vmatprep.subr.bf16.mxu0 %v3468_v53  ;;  %3126 = vmatprep.subr.bf16.mxu1 %v3475_v58 }
 0x31a   :  { %3305 = vmatpush3.bf16.msra.mxu0 %v3468_v53  ;;  %3127 = vmatpush3.bf16.msra.mxu1 %v3476_v59 }
 0x31b   :  { %3306 = vmatprep.subr.bf16.mxu0 %v3471_v33 }
 0x31e   :  { %3307 = vmatpush3.bf16.msra.mxu0 %v3471_v33 }
 0x31f   :  { %3308 = vmatprep.subr.bf16.mxu0 %v3474_v45 }
 0x322   :  { %3309 = vmatpush3.bf16.msra.mxu0 %v3474_v45 }
 0x323   :  { %3310 = vmatprep.subr.bf16.mxu0 %v3477_v29 }
 0x326   :  { %3311 = vmatpush3.bf16.msra.mxu0 %v3477_v29 }
 0x3c9   :  { %v3818_v27 = vpop.f32.mrf.mxu0 }
 0x3ca   :  { %v677_v3 = vmul.f32 %v3818_v27, %v3818_v27 }
 0x3cb   :  { %v3820_v60 = vpop.f32.mrf.mxu0 }
 0x3cc   :  { %v675_v0 = vmul.f32 %v3820_v60, %v3820_v60 }
 0x3cd   :  { %v3822_v61 = vpop.f32.mrf.mxu0 }
 0x3ce   :  { %v678_v6 = vmul.f32 %v3822_v61, %v3822_v61 }
 0x3cf   :  { %v3824_v62 = vpop.f32.mrf.mxu0 }
 0x3d0   :  { %v666_v1 = vadd.f32 %v3824_v62, %v3820_v60  ;;  %v676_v2 = vmul.f32 %v3824_v62, %v3824_v62 }
 0x3d2   :  { %v667_v4 = vadd.f32 %v3818_v27, %v666_v1  ;;  %v679_v5 = vadd.f32 %v676_v2, %v675_v0 }
 0x3d4   :  { %v668_v7 = vadd.f32 %v3822_v61, %v667_v4  ;;  %v680_v9 = vadd.f32 %v679_v5, %v677_v3 }
 0x3d6   :  { %v669_v10 = vrot.slane %v668_v7, 4  ;;  %v681_v11 = vadd.f32 %v680_v9, %v678_v6 }
 0x3d8   :  { %v670_v12 = vadd.f32 %v669_v10, %v668_v7  ;;  %v682_v13 = vrot.slane %v681_v11, 4 }
 0x3da   :  { %v671_v14 = vrot.slane %v670_v12, 2  ;;  %v683_v15 = vadd.f32 %v682_v13, %v681_v11  ;;  %v702_v11 = vld [vmem:[%s4490_s5] sm:$0x1] }
 0x3dc   :  { %v672_v16 = vadd.f32 %v671_v14, %v670_v12  ;;  %v684_v17 = vrot.slane %v683_v15, 2  ;;  %v728_v14 = vld [vmem:[%s4491_s6] sm:$0x1] }
 0x3de   :  { %v673_v18 = vrot.slane %v672_v16, 1  ;;  %v685_v19 = vadd.f32 %v684_v17, %v683_v15 }
 0x3e0   :  { %v686_v20 = vrot.slane %v685_v19, 1  ;;  %v674_v21 = vadd.f32 %v673_v18, %v672_v16 }
 0x3e2   :  { %v687_v22 = vadd.f32 %v686_v20, %v685_v19 }
 0x3e4   :  { %v688_v23 = vsel %vm124_vm1, %v674_v21, %v687_v22 }
 0x3e5   :  { %689 = vrot.lane.b32.xlu0 %v688_v23, %s3570_s11 }
 0x457   :  { %v690_v24 = vpop.permute.xlu0 %689 }
 0x458   :  { %v691_v26 = vadd.f32 %v690_v24, %v688_v23  ;;  %v3566_v24 = vld [vmem:[%s4486_s0] sm:$0xff] }
 0x45a   :  { %692 = vrot.lane.b32.xlu1 %v691_v26, %s3571_s12 }
 0x4cc   :  { %v693_v28 = vpop.permute.xlu1 %692 }
 0x4cd   :  { %v694_v30 = vadd.f32 %v693_v28, %v691_v26  ;;  %v3567_v28 = vld [vmem:[%s4486_s0 + $0x8] sm:$0xff] }
 0x4cf   :  { %695 = vrot.lane.b32.xlu0 %v694_v30, %s3572_s13 }
 0x541   :  { %v696_v31 = vpop.permute.xlu0 %695 }
 0x542   :  { %v697_v34 = vadd.f32 %v696_v31, %v694_v30 }
 0x544   :  { %698 = vrot.lane.b32.xlu1 %v697_v34, %s3573_s14 }
 0x5b6   :  { %v699_v0 = vpop.permute.xlu1 %698 }
 0x5b7   :  { %v700_v1 = vadd.f32 %v699_v0, %v697_v34 }
 0x5b9   :  { %v701_v2 = vmul.f32 0.001953125, %v700_v1 }
 0x5bb   :  { %v703_v3 = vmul.f32 %v701_v2, %v701_v2 }
 0x5bd   :  { %v705_v4 = vrot.slane %v703_v3, 7 }
 0x5bf   :  { %v707_v5 = vsub.f32 %v701_v2, %v705_v4 }
 0x5c1   :  { %v708_v6 = vadd.f32 1e-05, %v707_v5 }
 0x5c3   :  { %3552 = vrsqrt.f32 %v708_v6 }
 0x5d0   :  { %v3553_v7 = vpop.eup %3552 }
 0x5d1   :  { %v717_v9 = vrot.slane %v3553_v7, %v3799_v25 }
 0x5d3   :  { %v718_v10 = vcombine.high %v717_v9, %v717_v9 }
 0x5d5   :  { %v725_v12 = vrot.slane %v718_v10, %v3799_v25 }
 0x5d7   :  { %v727_v13 = vmul.f32 %v725_v12, %v702_v11 }
 0x5d9   :  { %v729_v15 = vmul.f32 %v727_v13, %v701_v2  ;;  %v735_v16 = vrot.slane %v727_v13, %v3806_v32 }
 0x5db   :  { %v730_v17 = vsub.f32 %v728_v14, %v729_v15  ;;  %v737_v18 = vmul.f32 %v735_v16, %v3820_v60  ;;  %v738_v19 = vmul.f32 %v735_v16, %v3824_v62  ;;  %v739_v20 = vmul.f32 %v3818_v27, %v735_v16  ;;  %v3568_v27 = vld [vmem:[%s4486_s0 + $0x18] sm:$0xff] }
 0x5dc   :  { %v740_v21 = vmul.f32 %v3822_v61, %v735_v16 }
 0x5dd   :  { %v743_v22 = vadd.f32 %v739_v20, %v3724_v44  ;;  %v749_v23 = vrot.slane %v730_v17, %v3806_v32  ;;  %v741_v26 = vadd.f32 %v3566_v24, %v737_v18  ;;  %v742_v60 = vadd.f32 %v3567_v28, %v738_v19 }
 0x5de   :  { %v744_v62 = vadd.f32 %v3568_v27, %v740_v21 }
 0x5df   :  { %v3939_v61 = vadd.f32 %v749_v23, %v743_v22  ;;  %v3941_v44 = vadd.f32 %v749_v23, %v741_v26  ;;  %v3943_v30 = vadd.f32 %v749_v23, %v742_v60 }
 0x5e0   :  { %v3945_v31 = vadd.f32 %v749_v23, %v744_v62 }
 0x5e1   :  { %vm755_vm14 = vcmp.ge.f32.partialorder %v3941_v44, 0.0  ;;  %vm756_vm15 = vcmp.ge.f32.partialorder %v3943_v30, 0.0  ;;  %v759_v34 = vmul.f32 0.01, %v3941_v44  ;;  %v760_v36 = vmul.f32 0.01, %v3943_v30 }
 0x5e2   :  { %vm757_vm0 = vcmp.ge.f32.partialorder %v3939_v61, 0.0  ;;  %v761_v37 = vmul.f32 0.01, %v3939_v61  ;;  %vm758_vm2 = vcmp.ge.f32.partialorder %v3945_v31, 0.0  ;;  %v762_v38 = vmul.f32 0.01, %v3945_v31 }
 0x5e3   :  { %v763_v41 = vsel %vm755_vm14, %v3941_v44, %v759_v34  ;;  %v764_v42 = vsel %vm756_vm15, %v3943_v30, %v760_v36 }
 0x5e4   :  { %v771_v43 = vrot.slane %v763_v41, 7  ;;  %v772_v46 = vrot.slane %v764_v42, 7  ;;  %v788_v47 = vrot.slane %v764_v42, 1  ;;  %v804_v8 = vpack.c.bf16 %v764_v42, %v763_v41 }
 0x5e5   :  { %v765_v48 = vsel %vm757_vm0, %v3939_v61, %v761_v37  ;;  %v766_v49 = vsel %vm758_vm2, %v3945_v31, %v762_v38  ;;  %v787_v50 = vrot.slane %v763_v41, 1 }
 0x5e6   :  { %v782_v51 = vsel %vm124_vm1, 0.0, %v771_v43  ;;  %v790_v52 = vrot.slane %v765_v48, 1  ;;  %1034 = vmatprep.mubr.bf16.mxu1 %v804_v8  ;;  %v792_v54 = vrot.slane %v766_v49, 1  ;;  %v773_v55 = vsel %vm124_vm1, %v771_v43, %v772_v46 }
 0x5e7   :  { %v783_v53 = vmul.f32 %v3713_v39, %v782_v51  ;;  %v774_v56 = vrot.slane %v765_v48, 7  ;;  %v789_v59 = vsel %vm141_vm4, %v787_v50, %v788_v47  ;;  %v807_v29 = vpack.c.bf16 %v766_v49, %v765_v48 }
 0x5e8   :  { %v791_v33 = vsel %vm141_vm4, %v788_v47, %v790_v52  ;;  %v798_v58 = vsel %vm141_vm4, %v792_v54, 0.0  ;;  %v793_v3 = vsel %vm141_vm4, %v790_v52, %v792_v54  ;;  %v776_v4 = vrot.slane %v766_v49, 7 }
 0x5e9   :  { %v803_v45 = vpack.c.bf16 %v773_v55, %v783_v53  ;;  %v800_v57 = vmul.f32 %v3700_v35, %v791_v33  ;;  %v802_v0 = vmul.f32 %v3715_v40, %v798_v58  ;;  %v775_v1 = vsel %vm124_vm1, %v772_v46, %v774_v56 }
 0x5ea   :  { %v785_v6 = vmul.f32 %v3739_v63, %v775_v1  ;;  %v777_v7 = vsel %vm124_vm1, %v774_v56, %v776_v4  ;;  %v3478_v4 = vld [vmem:[%s4487_s4 + $0x78] sm:$0xff]  }
 0x5eb   :  { %1035 = vmatmul.mubr.bf16.vlgmr.msra.gmra.mxu1 %v803_v45  ;;  %v805_v2 = vpack.c.bf16 %v800_v57, %v789_v59  ;;  %v808_v5 = vpack.c.bf16 %v802_v0, %v793_v3  ;;  %3316 = vmatprep.subr.bf16.mxu1 %v3478_v4 }
 0x5ec   :  { %1042 = vmatprep.mubr.bf16.mxu1 %v807_v29  ;;  %v806_v9 = vpack.c.bf16 %v777_v7, %v785_v6  ;;  %3317 = vmatpush3.bf16.msra.mxu1 %v3478_v4  ;;  %v3480_v6 = vld [vmem:[%s4487_s4 + $0x68] sm:$0xff]   ;;  %v3481_v7 = vld [vmem:[%s4487_s4 + $0x60] sm:$0xff]  }
 0x5ed   :  { %3312 = vmatprep.mubr.bf16.mxu0 %v805_v2 }
 0x5ee   :  { %3313 = vmatmul.mubr.bf16.vlgmr.msra.gmra.mxu0 %v808_v5  ;;  %v3479_v5 = vld [vmem:[%s4487_s4 + $0x70] sm:$0xff]  }
 0x5ef   :  { %3318 = vmatprep.subr.bf16.mxu1 %v3479_v5 }
 0x5f0   :  { %3319 = vmatpush3.bf16.msra.mxu1 %v3479_v5 }
 0x5f1   :  { %3320 = vmatprep.subr.bf16.mxu1 %v3480_v6 }
 0x5f3   :  { %1043 = vmatmul.mubr.bf16.gmra.mxu1 %v806_v9  ;;  %v3482_v9 = vld [vmem:[%s4487_s4 + $0x58] sm:$0xff]  }
 0x5f4   :  { %3321 = vmatpush3.bf16.msra.mxu1 %v3480_v6 }
 0x5f5   :  { %3322 = vmatprep.subr.bf16.mxu1 %v3481_v7 }
 0x5f8   :  { %3323 = vmatpush3.bf16.msra.mxu1 %v3481_v7 }
 0x5f9   :  { %3324 = vmatprep.subr.bf16.mxu1 %v3482_v9 }
 0x5fc   :  { %3325 = vmatpush3.bf16.msra.mxu1 %v3482_v9 }
 0x6ab   :  { %v3128_v10 = vpop.f32.mrf.mxu1 }
 0x6ad   :  { %v3129_v11 = vpop.f32.mrf.mxu1 }
 0x6ae   :  { %v3314_v12 = vpop.f32.mrf.mxu0  ;;  %v3130_v16 = vadd.f32 %v3129_v11, %v3128_v10  ;;  %v3483_v10 = vld [vmem:[%s4487_s4 + $0x50] sm:$0xff]   ;;  %v3484_v11 = vld [vmem:[%s4487_s4 + $0x48] sm:$0xff]  }
 0x6af   :  { %v3131_v13 = vpop.f32.mrf.mxu1  ;;  %3326 = vmatprep.subr.bf16.mxu1 %v3483_v10 }
 0x6b0   :  { %v1085_v14 = vpop.f32.mrf.mxu0  ;;  %3327 = vmatpush3.bf16.msra.mxu1 %v3483_v10 }
 0x6b1   :  { %v3132_v15 = vpop.f32.mrf.mxu1  ;;  %v3973_v23 = vadd.f32 %v3130_v16, %v1085_v14  ;;  %3328 = vmatprep.subr.bf16.mxu1 %v3484_v11 }
 0x6b2   :  { %v3315_v17 = vpop.f32.mrf.mxu0  ;;  %v3133_v18 = vadd.f32 %v3132_v15, %v3131_v13 }
 0x6b3   :  { %v3134_v19 = vpop.f32.mrf.mxu1  ;;  %v1109_v62 = vmul.f32 %v3973_v23, %v3973_v23 }
 0x6b4   :  { %v1088_v20 = vpop.f32.mrf.mxu0  ;;  %3329 = vmatpush3.bf16.msra.mxu1 %v3484_v11 }
 0x6b5   :  { %v3971_v21 = vadd.f32 %v3133_v18, %v1088_v20  ;;  %v3135_v22 = vpop.f32.mrf.mxu1 }
 0x6b6   :  { %v3136_v24 = vadd.f32 %v3135_v22, %v3134_v19 }
 0x6b7   :  { %v3137_v26 = vpop.f32.mrf.mxu1  ;;  %v1110_v28 = vmul.f32 %v3971_v21, %v3971_v21  ;;  %v1100_v34 = vadd.f32 %v3971_v21, %v3973_v23 }
 0x6b8   :  { %v3977_v60 = vadd.f32 %v3314_v12, %v3136_v24  ;;  %v3485_v12 = vld [vmem:[%s4487_s4 + $0x40] sm:$0xff]  }
 0x6b9   :  { %v3138_v27 = vpop.f32.mrf.mxu1  ;;  %v1113_v38 = vadd.f32 %v1110_v28, %v1109_v62  ;;  %3330 = vmatprep.subr.bf16.mxu1 %v3485_v12  ;;  %v2837_v62 = vld [vmem:[%s4489_s3 + $0x1] sm:$0x1] }
 0x6ba   :  { %v1111_v36 = vmul.f32 %v3977_v60, %v3977_v60  ;;  %v3139_v37 = vadd.f32 %v3138_v27, %v3137_v26  ;;  %v1101_v41 = vadd.f32 %v1100_v34, %v3977_v60  ;;  %3331 = vmatpush3.bf16.msra.mxu1 %v3485_v12  ;;  %v2836_v26 = vld [vmem:[%s4488_s2 + $0x1] sm:$0x1] }
 0x6bc   :  { %v3986_v42 = vadd.f32 %v3315_v17, %v3139_v37  ;;  %v1114_v43 = vadd.f32 %v1113_v38, %v1111_v36 }
 0x6be   :  { %v1102_v46 = vadd.f32 %v1101_v41, %v3986_v42  ;;  %v1112_v47 = vmul.f32 %v3986_v42, %v3986_v42 }
 0x6c0   :  { %v1103_v8 = vrot.slane %v1102_v46, 4  ;;  %v1115_v48 = vadd.f32 %v1114_v43, %v1112_v47 }
 0x6c2   :  { %v1104_v49 = vadd.f32 %v1103_v8, %v1102_v46  ;;  %v1116_v50 = vrot.slane %v1115_v48, 4 }
 0x6c4   :  { %v1105_v51 = vrot.slane %v1104_v49, 2  ;;  %v1117_v52 = vadd.f32 %v1116_v50, %v1115_v48 }
 0x6c6   :  { %v1106_v53 = vadd.f32 %v1105_v51, %v1104_v49  ;;  %v1118_v54 = vrot.slane %v1117_v52, 2 }
 0x6c8   :  { %v1107_v55 = vrot.slane %v1106_v53, 1  ;;  %v1119_v33 = vadd.f32 %v1118_v54, %v1117_v52 }
 0x6ca   :  { %v1120_v56 = vrot.slane %v1119_v33, 1  ;;  %v1108_v45 = vadd.f32 %v1107_v55, %v1106_v53 }
 0x6cc   :  { %v1121_v57 = vadd.f32 %v1120_v56, %v1119_v33 }
 0x6ce   :  { %v1122_v58 = vsel %vm124_vm1, %v1108_v45, %v1121_v57 }
 0x6cf   :  { %1123 = vrot.lane.b32.xlu0 %v1122_v58, %s3570_s11 }
 0x741   :  { %v1124_v59 = vpop.permute.xlu0 %1123 }
 0x742   :  { %v1125_v29 = vadd.f32 %v1124_v59, %v1122_v58 }
 0x744   :  { %1126 = vrot.lane.b32.xlu1 %v1125_v29, %s3571_s12 }
 0x7b6   :  { %v1127_v0 = vpop.permute.xlu1 %1126 }
 0x7b7   :  { %v1128_v1 = vadd.f32 %v1127_v0, %v1125_v29 }
 0x7b9   :  { %1129 = vrot.lane.b32.xlu0 %v1128_v1, %s3572_s13 }
 0x82b   :  { %v1130_v2 = vpop.permute.xlu0 %1129 }
 0x82c   :  { %v1131_v3 = vadd.f32 %v1130_v2, %v1128_v1 }
 0x82e   :  { %1132 = vrot.lane.b32.xlu1 %v1131_v3, %s3573_s14 }
 0x8a0   :  { %v1133_v13 = vpop.permute.xlu1 %1132 }
 0x8a1   :  { %v1134_v14 = vadd.f32 %v1133_v13, %v1131_v3 }
 0x8a3   :  { %v1135_v15 = vmul.f32 0.001953125, %v1134_v14 }
 0x8a5   :  { %v1138_v16 = vmul.f32 %v1135_v15, %v1135_v15 }
 0x8a7   :  { %v1140_v17 = vrot.slane %v1138_v16, 7 }
 0x8a9   :  { %v1142_v18 = vsub.f32 %v1135_v15, %v1140_v17 }
 0x8ab   :  { %v1143_v19 = vadd.f32 1e-05, %v1142_v18 }
 0x8ad   :  { %3554 = vrsqrt.f32 %v1143_v19 }
 0x8ba   :  { %v3555_v20 = vpop.eup %3554 }
 0x8bb   :  { %v1152_v22 = vrot.slane %v3555_v20, %v3799_v25 }
 0x8bd   :  { %v1153_v24 = vcombine.high %v1152_v22, %v1152_v22 }
 0x8bf   :  { %v1160_v28 = vrot.slane %v1153_v24, %v3799_v25 }
 0x8c1   :  { %v1162_v27 = vmul.f32 %v2836_v26, %v1160_v28 }
 0x8c3   :  { %v1165_v34 = vmul.f32 %v1162_v27, %v1135_v15  ;;  %v1171_v36 = vrot.slane %v1162_v27, %v3806_v32 }
 0x8c5   :  { %v1166_v37 = vsub.f32 %v2837_v62, %v1165_v34  ;;  %v1175_v38 = vmul.f32 %v1171_v36, %v3977_v60  ;;  %v1176_v41 = vmul.f32 %v1171_v36, %v3986_v42  ;;  %v1173_v46 = vmul.f32 %v1171_v36, %v3973_v23 }
 0x8c6   :  { %v1174_v47 = vmul.f32 %v1171_v36, %v3971_v21  ;;  %v3486_v36 = vld [vmem:[%s4485_s1 + $0x1f8] sm:$0xff]  }
 0x8c7   :  { %v1181_v43 = vrot.slane %v1166_v37, %v3806_v32  ;;  %v3487_v37 = vld [vmem:[%s4485_s1 + $0x1b8] sm:$0xff]   ;;  %3160 = vmatprep.subr.bf16.mxu0 %v3486_v36 }
 0x8c8   :  { %3161 = vmatpush3.bf16.msra.mxu0 %v3487_v37 }
 0x8c9   :  { %v1183_v8 = vadd.f32 %v1181_v43, %v1173_v46  ;;  %v1184_v48 = vadd.f32 %v1181_v43, %v1174_v47  ;;  %v1185_v49 = vadd.f32 %v1181_v43, %v1175_v38  ;;  %v1186_v50 = vadd.f32 %v1181_v43, %v1176_v41  ;;  %v3488_v38 = vld [vmem:[%s4485_s1 + $0x238] sm:$0xff]   ;;  %v3489_v41 = vld [vmem:[%s4485_s1 + $0x1f0] sm:$0xff]   ;;  %v3492_v47 = vld [vmem:[%s4485_s1 + $0x1e8] sm:$0xff]  }
 0x8ca   :  { %3336 = vmatprep.subr.bf16.mxu1 %v3488_v38  ;;  %v3490_v43 = vld [vmem:[%s4485_s1 + $0x1b0] sm:$0xff]   ;;  %3162 = vmatprep.subr.bf16.mxu0 %v3489_v41 }
 0x8cb   :  { %vm1187_vm3 = vcmp.ge.f32.partialorder %v1183_v8, 0.0  ;;  %vm1188_vm5 = vcmp.ge.f32.partialorder %v1184_v48, 0.0  ;;  %v1191_v51 = vmul.f32 0.01, %v1183_v8  ;;  %v1192_v52 = vmul.f32 0.01, %v1184_v48 }
 0x8cc   :  { %vm1189_vm6 = vcmp.ge.f32.partialorder %v1185_v49, 0.0  ;;  %vm1190_vm7 = vcmp.ge.f32.partialorder %v1186_v50, 0.0  ;;  %v1193_v53 = vmul.f32 0.01, %v1185_v49  ;;  %v1194_v60 = vmul.f32 0.01, %v1186_v50  ;;  %3163 = vmatpush3.bf16.msra.mxu0 %v3490_v43 }
 0x8cd   :  { %v1195_v54 = vsel %vm1187_vm3, %v1183_v8, %v1191_v51  ;;  %v1196_v42 = vsel %vm1188_vm5, %v1184_v48, %v1192_v52  ;;  %v3491_v46 = vld [vmem:[%s4485_s1 + $0x230] sm:$0xff]   ;;  %v3493_v8 = vld [vmem:[%s4485_s1 + $0x1a8] sm:$0xff]   ;;  %3164 = vmatprep.subr.bf16.mxu0 %v3492_v47  ;;  %v3497_v51 = vld [vmem:[%s4485_s1 + $0x220] sm:$0xff]  }
 0x8ce   :  { %v1199_v55 = vpack.c.bf16 %v1196_v42, %v1195_v54  ;;  %v1197_v33 = vsel %vm1189_vm6, %v1185_v49, %v1193_v53  ;;  %v1198_v56 = vsel %vm1190_vm7, %v1186_v50, %v1194_v60  ;;  %v3494_v48 = vld [vmem:[%s4485_s1 + $0x228] sm:$0xff]   ;;  %v3495_v49 = vld [vmem:[%s4485_s1 + $0x1e0] sm:$0xff]   ;;  %v3498_v52 = vld [vmem:[%s4485_s1 + $0x1d8] sm:$0xff]  }
 0x8cf   :  { %v1200_v23 = vpack.c.bf16 %v1198_v56, %v1197_v33  ;;  %v3496_v50 = vld [vmem:[%s4485_s1 + $0x1a0] sm:$0xff]   ;;  %v3499_v53 = vld [vmem:[%s4485_s1 + $0x198] sm:$0xff]   ;;  %v3501_v54 = vld [vmem:[%s4485_s1 + $0x1d0] sm:$0xff]  }
 0x8d0   :  { %3332 = vmatprep.mubr.bf16.mxu1 %v1199_v55  ;;  %3165 = vmatpush3.bf16.msra.mxu0 %v3493_v8  ;;  %v3500_v60 = vld [vmem:[%s4485_s1 + $0x218] sm:$0xff]   ;;  %v3503_v42 = vld [vmem:[%s4485_s1 + $0x210] sm:$0xff]   ;;  %v3504_v33 = vld [vmem:[%s4485_s1 + $0x1c8] sm:$0xff]  }
 0x8d1   :  { %3333 = vmatmul.mubr.bf16.vlgmr.msra.gmra.mxu1 %v1200_v23  ;;  %3166 = vmatprep.subr.bf16.mxu0 %v3495_v49  ;;  %v3502_v55 = vld [vmem:[%s4485_s1 + $0x190] sm:$0xff]   ;;  %v3506_v56 = vld [vmem:[%s4485_s1 + $0x208] sm:$0xff]  }
 0x8d2   :  { %3337 = vmatpush3.bf16.msra.mxu1 %v3488_v38  ;;  %v3505_v23 = vld [vmem:[%s4485_s1 + $0x188] sm:$0xff]  }
 0x8d3   :  { %3338 = vmatprep.subr.bf16.mxu1 %v3491_v46 }
 0x8d4   :  { %3167 = vmatpush3.bf16.msra.mxu0 %v3496_v50 }
 0x8d5   :  { %3168 = vmatprep.subr.bf16.mxu0 %v3498_v52 }
 0x8d6   :  { %3339 = vmatpush3.bf16.msra.mxu1 %v3491_v46 }
 0x8d7   :  { %3340 = vmatprep.subr.bf16.mxu1 %v3494_v48 }
 0x8d8   :  { %3169 = vmatpush3.bf16.msra.mxu0 %v3499_v53 }
 0x8d9   :  { %3170 = vmatprep.subr.bf16.mxu0 %v3501_v54 }
 0x8da   :  { %3341 = vmatpush3.bf16.msra.mxu1 %v3494_v48 }
 0x8db   :  { %3342 = vmatprep.subr.bf16.mxu1 %v3497_v51 }
 0x8dc   :  { %3171 = vmatpush3.bf16.msra.mxu0 %v3502_v55 }
 0x8dd   :  { %3172 = vmatprep.subr.bf16.mxu0 %v3504_v33 }
 0x8de   :  { %3343 = vmatpush3.bf16.msra.mxu1 %v3497_v51 }
 0x8df   :  { %3344 = vmatprep.subr.bf16.mxu1 %v3500_v60 }
 0x8e0   :  { %3173 = vmatpush3.bf16.msra.mxu0 %v3505_v23 }
 0x8e2   :  { %3345 = vmatpush3.bf16.msra.mxu1 %v3500_v60 }
 0x8e3   :  { %3346 = vmatprep.subr.bf16.mxu1 %v3503_v42 }
 0x8e6   :  { %3347 = vmatpush3.bf16.msra.mxu1 %v3503_v42 }
 0x8e7   :  { %3348 = vmatprep.subr.bf16.mxu1 %v3506_v56 }
 0x8ea   :  { %3349 = vmatpush3.bf16.msra.mxu1 %v3506_v56 }
 0x991   :  { %v4034_v21 = vpop.f32.mrf.mxu1 }
 0x992   :  { %v1326_v1 = vmul.f32 %v4034_v21, %v4034_v21 }
 0x993   :  { %v4036_v45 = vpop.f32.mrf.mxu1 }
 0x994   :  { %v1324_v59 = vmul.f32 %v4036_v45, %v4036_v45 }
 0x995   :  { %v4038_v57 = vpop.f32.mrf.mxu1 }
 0x996   :  { %v1327_v4 = vmul.f32 %v4038_v57, %v4038_v57 }
 0x997   :  { %v4040_v58 = vpop.f32.mrf.mxu1 }
 0x998   :  { %v1315_v29 = vadd.f32 %v4040_v58, %v4036_v45  ;;  %v1325_v0 = vmul.f32 %v4040_v58, %v4040_v58 }
 0x99a   :  { %v1316_v2 = vadd.f32 %v4034_v21, %v1315_v29  ;;  %v1328_v3 = vadd.f32 %v1325_v0, %v1324_v59  ;;  %v3507_v59 = vld [vmem:[%s4485_s1 + $0x1c0] sm:$0xff]  }
 0x99b   :  { %v3509_v29 = vld [vmem:[%s4485_s1 + $0x200] sm:$0xff]   ;;  %3174 = vmatprep.subr.bf16.mxu0 %v3507_v59 }
 0x99c   :  { %v1317_v5 = vadd.f32 %v4038_v57, %v1316_v2  ;;  %v1329_v6 = vadd.f32 %v1328_v3, %v1326_v1  ;;  %v3508_v0 = vld [vmem:[%s4485_s1 + $0x180] sm:$0xff]   ;;  %3350 = vmatprep.subr.bf16.mxu1 %v3509_v29 }
 0x99d   :  { %3175 = vmatpush3.bf16.msra.mxu0 %v3508_v0  ;;  %3351 = vmatpush3.bf16.msra.mxu1 %v3509_v29 }
 0x99e   :  { %v1318_v7 = vrot.slane %v1317_v5, 4  ;;  %v1330_v9 = vadd.f32 %v1329_v6, %v1327_v4 }
 0x9a0   :  { %v1319_v10 = vadd.f32 %v1318_v7, %v1317_v5  ;;  %v1331_v11 = vrot.slane %v1330_v9, 4 }
 0x9a2   :  { %v1320_v12 = vrot.slane %v1319_v10, 2  ;;  %v1332_v13 = vadd.f32 %v1331_v11, %v1330_v9 }
 0x9a4   :  { %v1321_v14 = vadd.f32 %v1320_v12, %v1319_v10  ;;  %v1333_v15 = vrot.slane %v1332_v13, 2  ;;  %v2862_v12 = vld [vmem:[%s4490_s5 + $0x1] sm:$0x1] }
 0x9a6   :  { %v1322_v16 = vrot.slane %v1321_v14, 1  ;;  %v1334_v17 = vadd.f32 %v1333_v15, %v1332_v13  ;;  %v2863_v15 = vld [vmem:[%s4491_s6 + $0x1] sm:$0x1] }
 0x9a8   :  { %v1335_v18 = vrot.slane %v1334_v17, 1  ;;  %v1323_v19 = vadd.f32 %v1322_v16, %v1321_v14 }
 0x9aa   :  { %v1336_v20 = vadd.f32 %v1335_v18, %v1334_v17 }
 0x9ac   :  { %v1337_v22 = vsel %vm124_vm1, %v1323_v19, %v1336_v20 }
 0x9ad   :  { %1338 = vrot.lane.b32.xlu0 %v1337_v22, %s3570_s11 }
 0xa1f   :  { %v1339_v24 = vpop.permute.xlu0 %1338 }
 0xa20   :  { %v1340_v26 = vadd.f32 %v1339_v24, %v1337_v22 }
 0xa22   :  { %1341 = vrot.lane.b32.xlu1 %v1340_v26, %s3571_s12 }
 0xa94   :  { %v1342_v28 = vpop.permute.xlu1 %1341 }
 0xa95   :  { %v1343_v27 = vadd.f32 %v1342_v28, %v1340_v26 }
 0xa97   :  { %1344 = vrot.lane.b32.xlu0 %v1343_v27, %s3572_s13 }
 0xb09   :  { %v1345_v62 = vpop.permute.xlu0 %1344 }
 0xb0a   :  { %v1346_v34 = vadd.f32 %v1345_v62, %v1343_v27 }
 0xb0c   :  { %1347 = vrot.lane.b32.xlu1 %v1346_v34, %s3573_s14 }
 0xb7e   :  { %v1348_v1 = vpop.permute.xlu1 %1347 }
 0xb7f   :  { %v1349_v2 = vadd.f32 %v1348_v1, %v1346_v34 }
 0xb81   :  { %v1350_v3 = vmul.f32 0.001953125, %v1349_v2 }
 0xb83   :  { %v1353_v4 = vmul.f32 %v1350_v3, %v1350_v3 }
 0xb85   :  { %v1355_v5 = vrot.slane %v1353_v4, 7 }
 0xb87   :  { %v1357_v6 = vsub.f32 %v1350_v3, %v1355_v5 }
 0xb89   :  { %v1358_v7 = vadd.f32 1e-05, %v1357_v6 }
 0xb8b   :  { %3556 = vrsqrt.f32 %v1358_v7 }
 0xb98   :  { %v3557_v9 = vpop.eup %3556 }
 0xb99   :  { %v1367_v10 = vrot.slane %v3557_v9, %v3799_v25 }
 0xb9b   :  { %v1368_v11 = vcombine.high %v1367_v10, %v1367_v10 }
 0xb9d   :  { %v1375_v13 = vrot.slane %v1368_v11, %v3799_v25 }
 0xb9f   :  { %v1377_v14 = vmul.f32 %v2862_v12, %v1375_v13 }
 0xba1   :  { %v1380_v16 = vmul.f32 %v1377_v14, %v1350_v3  ;;  %v1386_v17 = vrot.slane %v1377_v14, %v3806_v32 }
 0xba3   :  { %v1381_v18 = vsub.f32 %v2863_v15, %v1380_v16  ;;  %v1388_v19 = vmul.f32 %v1386_v17, %v4036_v45  ;;  %v1389_v20 = vmul.f32 %v1386_v17, %v4040_v58  ;;  %v1390_v22 = vmul.f32 %v4034_v21, %v1386_v17 }
 0xba4   :  { %v1391_v24 = vmul.f32 %v4038_v57, %v1386_v17 }
 0xba5   :  { %v1394_v26 = vadd.f32 %v1390_v22, %v3939_v61  ;;  %v1400_v28 = vrot.slane %v1381_v18, %v3806_v32  ;;  %v1392_v27 = vadd.f32 %v1388_v19, %v3941_v44  ;;  %v1393_v62 = vadd.f32 %v1389_v20, %v3943_v30 }
 0xba6   :  { %v1395_v34 = vadd.f32 %v1391_v24, %v3945_v31 }
 0xba7   :  { %v4149_v36 = vadd.f32 %v1400_v28, %v1394_v26  ;;  %v4151_v37 = vadd.f32 %v1400_v28, %v1392_v27  ;;  %v4153_v45 = vadd.f32 %v1400_v28, %v1393_v62 }
 0xba8   :  { %v4155_v58 = vadd.f32 %v1400_v28, %v1395_v34 }
 0xba9   :  { %vm1406_vm8 = vcmp.ge.f32.partialorder %v4151_v37, 0.0  ;;  %vm1407_vm9 = vcmp.ge.f32.partialorder %v4153_v45, 0.0  ;;  %v1410_v61 = vmul.f32 0.01, %v4151_v37  ;;  %v1411_v44 = vmul.f32 0.01, %v4153_v45 }
 0xbaa   :  { %vm1408_vm10 = vcmp.ge.f32.partialorder %v4149_v36, 0.0  ;;  %v1412_v30 = vmul.f32 0.01, %v4149_v36  ;;  %vm1409_vm11 = vcmp.ge.f32.partialorder %v4155_v58, 0.0  ;;  %v1413_v31 = vmul.f32 0.01, %v4155_v58 }
 0xbab   :  { %v1414_v21 = vsel %vm1406_vm8, %v4151_v37, %v1410_v61  ;;  %v1415_v57 = vsel %vm1407_vm9, %v4153_v45, %v1411_v44 }
 0xbac   :  { %v1422_v38 = vrot.slane %v1414_v21, 7  ;;  %v1423_v41 = vrot.slane %v1415_v57, 7  ;;  %v1439_v43 = vrot.slane %v1415_v57, 1  ;;  %v1455_v46 = vpack.c.bf16 %v1415_v57, %v1414_v21 }
 0xbad   :  { %v1416_v47 = vsel %vm1408_vm10, %v4149_v36, %v1412_v30  ;;  %v1417_v8 = vsel %vm1409_vm11, %v4155_v58, %v1413_v31  ;;  %v1438_v48 = vrot.slane %v1414_v21, 1 }
 0xbae   :  { %v1433_v49 = vsel %vm124_vm1, 0.0, %v1422_v38  ;;  %v1441_v50 = vrot.slane %v1416_v47, 1  ;;  %1685 = vmatprep.mubr.bf16.mxu0 %v1455_v46  ;;  %v1443_v52 = vrot.slane %v1417_v8, 1  ;;  %v1424_v53 = vsel %vm124_vm1, %v1422_v38, %v1423_v41 }
 0xbaf   :  { %v1434_v51 = vmul.f32 %v3713_v39, %v1433_v49  ;;  %v1425_v54 = vrot.slane %v1416_v47, 7  ;;  %v1440_v56 = vsel %vm141_vm4, %v1438_v48, %v1439_v43  ;;  %v1458_v23 = vpack.c.bf16 %v1417_v8, %v1416_v47 }
 0xbb0   :  { %v1442_v60 = vsel %vm141_vm4, %v1439_v43, %v1441_v50  ;;  %v1449_v33 = vsel %vm141_vm4, %v1443_v52, 0.0  ;;  %v1444_v1 = vsel %vm141_vm4, %v1441_v50, %v1443_v52  ;;  %v1427_v2 = vrot.slane %v1417_v8, 7 }
 0xbb1   :  { %v1454_v42 = vpack.c.bf16 %v1424_v53, %v1434_v51  ;;  %v1451_v55 = vmul.f32 %v3700_v35, %v1442_v60  ;;  %v1453_v59 = vmul.f32 %v3715_v40, %v1449_v33  ;;  %v1426_v29 = vsel %vm124_vm1, %v1423_v41, %v1425_v54 }
 0xbb2   :  { %v1436_v4 = vmul.f32 %v3739_v63, %v1426_v29  ;;  %v1428_v5 = vsel %vm124_vm1, %v1425_v54, %v1427_v2  ;;  %v3510_v2 = vld [vmem:[%s4487_s4 + $0xb8] sm:$0xff]  }
 0xbb3   :  { %1686 = vmatmul.mubr.bf16.vlgmr.msra.gmra.mxu0 %v1454_v42  ;;  %v1456_v0 = vpack.c.bf16 %v1451_v55, %v1440_v56  ;;  %v1459_v3 = vpack.c.bf16 %v1453_v59, %v1444_v1  ;;  %3356 = vmatprep.subr.bf16.mxu0 %v3510_v2 }
 0xbb4   :  { %1693 = vmatprep.mubr.bf16.mxu0 %v1458_v23  ;;  %v1457_v6 = vpack.c.bf16 %v1428_v5, %v1436_v4  ;;  %3357 = vmatpush3.bf16.msra.mxu0 %v3510_v2  ;;  %v3512_v4 = vld [vmem:[%s4487_s4 + $0xa8] sm:$0xff]   ;;  %v3513_v5 = vld [vmem:[%s4487_s4 + $0xa0] sm:$0xff]  }
 0xbb5   :  { %3352 = vmatprep.mubr.bf16.mxu1 %v1456_v0 }
 0xbb6   :  { %3353 = vmatmul.mubr.bf16.vlgmr.msra.gmra.mxu1 %v1459_v3  ;;  %v3511_v3 = vld [vmem:[%s4487_s4 + $0xb0] sm:$0xff]  }
 0xbb7   :  { %3358 = vmatprep.subr.bf16.mxu0 %v3511_v3 }
 0xbb8   :  { %3359 = vmatpush3.bf16.msra.mxu0 %v3511_v3 }
 0xbb9   :  { %3360 = vmatprep.subr.bf16.mxu0 %v3512_v4 }
 0xbbb   :  { %1694 = vmatmul.mubr.bf16.gmra.mxu0 %v1457_v6  ;;  %v3514_v6 = vld [vmem:[%s4487_s4 + $0x98] sm:$0xff]  }
 0xbbc   :  { %3361 = vmatpush3.bf16.msra.mxu0 %v3512_v4 }
 0xbbd   :  { %3362 = vmatprep.subr.bf16.mxu0 %v3513_v5 }
 0xbc0   :  { %3363 = vmatpush3.bf16.msra.mxu0 %v3513_v5 }
 0xbc1   :  { %3364 = vmatprep.subr.bf16.mxu0 %v3514_v6 }
 0xbc4   :  { %3365 = vmatpush3.bf16.msra.mxu0 %v3514_v6 }
 0xc73   :  { %v3176_v7 = vpop.f32.mrf.mxu0 }
 0xc75   :  { %v3177_v9 = vpop.f32.mrf.mxu0 }
 0xc76   :  { %v3354_v10 = vpop.f32.mrf.mxu1  ;;  %v3178_v14 = vadd.f32 %v3177_v9, %v3176_v7  ;;  %v3515_v7 = vld [vmem:[%s4487_s4 + $0x90] sm:$0xff]   ;;  %v3516_v9 = vld [vmem:[%s4487_s4 + $0x88] sm:$0xff]  }
 0xc77   :  { %v3179_v11 = vpop.f32.mrf.mxu0  ;;  %3366 = vmatprep.subr.bf16.mxu0 %v3515_v7 }
 0xc78   :  { %v1736_v12 = vpop.f32.mrf.mxu1  ;;  %3367 = vmatpush3.bf16.msra.mxu0 %v3515_v7 }
 0xc79   :  { %v3180_v13 = vpop.f32.mrf.mxu0  ;;  %v4183_v22 = vadd.f32 %v3178_v14, %v1736_v12  ;;  %3368 = vmatprep.subr.bf16.mxu0 %v3516_v9 }
 0xc7a   :  { %v3355_v15 = vpop.f32.mrf.mxu1  ;;  %v3181_v16 = vadd.f32 %v3180_v13, %v3179_v11 }
 0xc7b   :  { %v3182_v17 = vpop.f32.mrf.mxu0  ;;  %v1760_v34 = vmul.f32 %v4183_v22, %v4183_v22 }
 0xc7c   :  { %v1739_v18 = vpop.f32.mrf.mxu1  ;;  %3369 = vmatpush3.bf16.msra.mxu0 %v3516_v9 }
 0xc7d   :  { %v4181_v19 = vadd.f32 %v3181_v16, %v1739_v18  ;;  %v3183_v20 = vpop.f32.mrf.mxu0 }
 0xc7e   :  { %v3184_v24 = vadd.f32 %v3183_v20, %v3182_v17 }
 0xc7f   :  { %v3185_v26 = vpop.f32.mrf.mxu0  ;;  %v1761_v28 = vmul.f32 %v4181_v19, %v4181_v19  ;;  %v1751_v61 = vadd.f32 %v4181_v19, %v4183_v22 }
 0xc80   :  { %v4187_v27 = vadd.f32 %v3354_v10, %v3184_v24  ;;  %v3517_v10 = vld [vmem:[%s4487_s4 + $0x80] sm:$0xff]  }
 0xc81   :  { %v3186_v62 = vpop.f32.mrf.mxu0  ;;  %v1764_v31 = vadd.f32 %v1761_v28, %v1760_v34  ;;  %3370 = vmatprep.subr.bf16.mxu0 %v3517_v10  ;;  %v2937_v34 = vld [vmem:[%s4489_s3 + $0x2] sm:$0x1] }
 0xc82   :  { %v1762_v44 = vmul.f32 %v4187_v27, %v4187_v27  ;;  %v3187_v30 = vadd.f32 %v3186_v62, %v3185_v26  ;;  %v1752_v21 = vadd.f32 %v1751_v61, %v4187_v27  ;;  %3371 = vmatpush3.bf16.msra.mxu0 %v3517_v10  ;;  %v2936_v26 = vld [vmem:[%s4488_s2 + $0x2] sm:$0x1] }
 0xc84   :  { %v4196_v57 = vadd.f32 %v3355_v15, %v3187_v30  ;;  %v1765_v38 = vadd.f32 %v1764_v31, %v1762_v44 }
 0xc86   :  { %v1753_v41 = vadd.f32 %v1752_v21, %v4196_v57  ;;  %v1763_v43 = vmul.f32 %v4196_v57, %v4196_v57 }
 0xc88   :  { %v1754_v46 = vrot.slane %v1753_v41, 4  ;;  %v1766_v47 = vadd.f32 %v1765_v38, %v1763_v43 }
 0xc8a   :  { %v1755_v8 = vadd.f32 %v1754_v46, %v1753_v41  ;;  %v1767_v48 = vrot.slane %v1766_v47, 4 }
 0xc8c   :  { %v1756_v49 = vrot.slane %v1755_v8, 2  ;;  %v1768_v50 = vadd.f32 %v1767_v48, %v1766_v47 }
 0xc8e   :  { %v1757_v51 = vadd.f32 %v1756_v49, %v1755_v8  ;;  %v1769_v52 = vrot.slane %v1768_v50, 2 }
 0xc90   :  { %v1758_v53 = vrot.slane %v1757_v51, 1  ;;  %v1770_v60 = vadd.f32 %v1769_v52, %v1768_v50 }
 0xc92   :  { %v1771_v54 = vrot.slane %v1770_v60, 1  ;;  %v1759_v42 = vadd.f32 %v1758_v53, %v1757_v51 }
 0xc94   :  { %v1772_v55 = vadd.f32 %v1771_v54, %v1770_v60 }
 0xc96   :  { %v1773_v33 = vsel %vm124_vm1, %v1759_v42, %v1772_v55 }
 0xc97   :  { %1774 = vrot.lane.b32.xlu0 %v1773_v33, %s3570_s11 }
 0xd09   :  { %v1775_v56 = vpop.permute.xlu0 %1774 }
 0xd0a   :  { %v1776_v23 = vadd.f32 %v1775_v56, %v1773_v33 }
 0xd0c   :  { %1777 = vrot.lane.b32.xlu1 %v1776_v23, %s3571_s12 }
 0xd7e   :  { %v1778_v59 = vpop.permute.xlu1 %1777 }
 0xd7f   :  { %v1779_v29 = vadd.f32 %v1778_v59, %v1776_v23 }
 0xd81   :  { %1780 = vrot.lane.b32.xlu0 %v1779_v29, %s3572_s13 }
 0xdf3   :  { %v1781_v0 = vpop.permute.xlu0 %1780 }
 0xdf4   :  { %v1782_v1 = vadd.f32 %v1781_v0, %v1779_v29 }
 0xdf6   :  { %1783 = vrot.lane.b32.xlu1 %v1782_v1, %s3573_s14 }
 0xe68   :  { %v1784_v11 = vpop.permute.xlu1 %1783 }
 0xe69   :  { %v1785_v12 = vadd.f32 %v1784_v11, %v1782_v1 }
 0xe6b   :  { %v1786_v13 = vmul.f32 0.001953125, %v1785_v12 }
 0xe6d   :  { %v1789_v14 = vmul.f32 %v1786_v13, %v1786_v13 }
 0xe6f   :  { %v1791_v15 = vrot.slane %v1789_v14, 7 }
 0xe71   :  { %v1793_v16 = vsub.f32 %v1786_v13, %v1791_v15 }
 0xe73   :  { %v1794_v17 = vadd.f32 1e-05, %v1793_v16 }
 0xe75   :  { %3558 = vrsqrt.f32 %v1794_v17 }
 0xe82   :  { %v3559_v18 = vpop.eup %3558 }
 0xe83   :  { %v1803_v20 = vrot.slane %v3559_v18, %v3799_v25 }
 0xe85   :  { %v1804_v24 = vcombine.high %v1803_v20, %v1803_v20 }
 0xe87   :  { %v1811_v28 = vrot.slane %v1804_v24, %v3799_v25 }
 0xe89   :  { %v1813_v62 = vmul.f32 %v2936_v26, %v1811_v28 }
 0xe8b   :  { %v1816_v61 = vmul.f32 %v1813_v62, %v1786_v13  ;;  %v1822_v44 = vrot.slane %v1813_v62, %v3806_v32 }
 0xe8d   :  { %v1817_v30 = vsub.f32 %v2937_v34, %v1816_v61  ;;  %v1826_v31 = vmul.f32 %v1822_v44, %v4187_v27  ;;  %v1827_v21 = vmul.f32 %v1822_v44, %v4196_v57  ;;  %v1824_v41 = vmul.f32 %v1822_v44, %v4183_v22 }
 0xe8e   :  { %v1825_v43 = vmul.f32 %v1822_v44, %v4181_v19  ;;  %v3518_v44 = vld [vmem:[%s4485_s1 + $0x2b8] sm:$0xff]  }
 0xe8f   :  { %v1832_v38 = vrot.slane %v1817_v30, %v3806_v32  ;;  %v3519_v30 = vld [vmem:[%s4485_s1 + $0x278] sm:$0xff]   ;;  %3208 = vmatprep.subr.bf16.mxu1 %v3518_v44 }
 0xe90   :  { %3209 = vmatpush3.bf16.msra.mxu1 %v3519_v30 }
 0xe91   :  { %v1834_v46 = vadd.f32 %v1832_v38, %v1824_v41  ;;  %v1835_v47 = vadd.f32 %v1832_v38, %v1825_v43  ;;  %v1836_v8 = vadd.f32 %v1832_v38, %v1826_v31  ;;  %v1837_v48 = vadd.f32 %v1832_v38, %v1827_v21  ;;  %v3520_v31 = vld [vmem:[%s4485_s1 + $0x2f8] sm:$0xff]   ;;  %v3521_v21 = vld [vmem:[%s4485_s1 + $0x2b0] sm:$0xff]   ;;  %v3524_v43 = vld [vmem:[%s4485_s1 + $0x2a8] sm:$0xff]  }
 0xe92   :  { %3376 = vmatprep.subr.bf16.mxu0 %v3520_v31  ;;  %v3522_v38 = vld [vmem:[%s4485_s1 + $0x270] sm:$0xff]   ;;  %3210 = vmatprep.subr.bf16.mxu1 %v3521_v21 }
 0xe93   :  { %vm1838_vm12 = vcmp.ge.f32.partialorder %v1834_v46, 0.0  ;;  %vm1839_vm13 = vcmp.ge.f32.partialorder %v1835_v47, 0.0  ;;  %v1842_v49 = vmul.f32 0.01, %v1834_v46  ;;  %v1843_v50 = vmul.f32 0.01, %v1835_v47 }
 0xe94   :  { %vm1840_vm14 = vcmp.ge.f32.partialorder %v1836_v8, 0.0  ;;  %vm1841_vm15 = vcmp.ge.f32.partialorder %v1837_v48, 0.0  ;;  %v1844_v51 = vmul.f32 0.01, %v1836_v8  ;;  %v1845_v27 = vmul.f32 0.01, %v1837_v48  ;;  %3211 = vmatpush3.bf16.msra.mxu1 %v3522_v38 }
 0xe95   :  { %v1846_v52 = vsel %vm1838_vm12, %v1834_v46, %v1842_v49  ;;  %v1847_v57 = vsel %vm1839_vm13, %v1835_v47, %v1843_v50  ;;  %v3523_v41 = vld [vmem:[%s4485_s1 + $0x2f0] sm:$0xff]   ;;  %v3525_v46 = vld [vmem:[%s4485_s1 + $0x268] sm:$0xff]   ;;  %3212 = vmatprep.subr.bf16.mxu1 %v3524_v43  ;;  %v3529_v49 = vld [vmem:[%s4485_s1 + $0x2e0] sm:$0xff]  }
 0xe96   :  { %v1850_v53 = vpack.c.bf16 %v1847_v57, %v1846_v52  ;;  %v1848_v60 = vsel %vm1840_vm14, %v1836_v8, %v1844_v51  ;;  %v1849_v54 = vsel %vm1841_vm15, %v1837_v48, %v1845_v27  ;;  %v3526_v47 = vld [vmem:[%s4485_s1 + $0x2e8] sm:$0xff]   ;;  %v3527_v8 = vld [vmem:[%s4485_s1 + $0x2a0] sm:$0xff]   ;;  %v3530_v50 = vld [vmem:[%s4485_s1 + $0x298] sm:$0xff]  }
 0xe97   :  { %v1851_v22 = vpack.c.bf16 %v1849_v54, %v1848_v60  ;;  %v3528_v48 = vld [vmem:[%s4485_s1 + $0x260] sm:$0xff]   ;;  %v3531_v51 = vld [vmem:[%s4485_s1 + $0x258] sm:$0xff]   ;;  %v3533_v52 = vld [vmem:[%s4485_s1 + $0x290] sm:$0xff]  }
 0xe98   :  { %3372 = vmatprep.mubr.bf16.mxu0 %v1850_v53  ;;  %3213 = vmatpush3.bf16.msra.mxu1 %v3525_v46  ;;  %v3532_v27 = vld [vmem:[%s4485_s1 + $0x2d8] sm:$0xff]   ;;  %v3535_v57 = vld [vmem:[%s4485_s1 + $0x2d0] sm:$0xff]   ;;  %v3536_v60 = vld [vmem:[%s4485_s1 + $0x288] sm:$0xff]  }
 0xe99   :  { %3373 = vmatmul.mubr.bf16.vlgmr.msra.gmra.mxu0 %v1851_v22  ;;  %3214 = vmatprep.subr.bf16.mxu1 %v3527_v8  ;;  %v3534_v53 = vld [vmem:[%s4485_s1 + $0x250] sm:$0xff]   ;;  %v3538_v54 = vld [vmem:[%s4485_s1 + $0x2c8] sm:$0xff]  }
 0xe9a   :  { %3377 = vmatpush3.bf16.msra.mxu0 %v3520_v31  ;;  %v3537_v22 = vld [vmem:[%s4485_s1 + $0x248] sm:$0xff]  }
 0xe9b   :  { %3378 = vmatprep.subr.bf16.mxu0 %v3523_v41 }
 0xe9c   :  { %3215 = vmatpush3.bf16.msra.mxu1 %v3528_v48 }
 0xe9d   :  { %3216 = vmatprep.subr.bf16.mxu1 %v3530_v50 }
 0xe9e   :  { %3379 = vmatpush3.bf16.msra.mxu0 %v3523_v41 }
 0xe9f   :  { %3380 = vmatprep.subr.bf16.mxu0 %v3526_v47 }
 0xea0   :  { %3217 = vmatpush3.bf16.msra.mxu1 %v3531_v51 }
 0xea1   :  { %3218 = vmatprep.subr.bf16.mxu1 %v3533_v52 }
 0xea2   :  { %3381 = vmatpush3.bf16.msra.mxu0 %v3526_v47 }
 0xea3   :  { %3382 = vmatprep.subr.bf16.mxu0 %v3529_v49 }
 0xea4   :  { %3219 = vmatpush3.bf16.msra.mxu1 %v3534_v53 }
 0xea5   :  { %3220 = vmatprep.subr.bf16.mxu1 %v3536_v60 }
 0xea6   :  { %3383 = vmatpush3.bf16.msra.mxu0 %v3529_v49 }
 0xea7   :  { %3384 = vmatprep.subr.bf16.mxu0 %v3532_v27 }
 0xea8   :  { %3221 = vmatpush3.bf16.msra.mxu1 %v3537_v22 }
 0xeaa   :  { %3385 = vmatpush3.bf16.msra.mxu0 %v3532_v27 }
 0xeab   :  { %3386 = vmatprep.subr.bf16.mxu0 %v3535_v57 }
 0xeae   :  { %3387 = vmatpush3.bf16.msra.mxu0 %v3535_v57 }
 0xeaf   :  { %3388 = vmatprep.subr.bf16.mxu0 %v3538_v54 }
 0xeb2   :  { %3389 = vmatpush3.bf16.msra.mxu0 %v3538_v54 }
 0xf59   :  { %v4244_v19 = vpop.f32.mrf.mxu0 }
 0xf5a   :  { %v1977_v29 = vmul.f32 %v4244_v19, %v4244_v19 }
 0xf5b   :  { %v4246_v42 = vpop.f32.mrf.mxu0 }
 0xf5c   :  { %v1975_v56 = vmul.f32 %v4246_v42, %v4246_v42 }
 0xf5d   :  { %v4248_v55 = vpop.f32.mrf.mxu0 }
 0xf5e   :  { %v1978_v2 = vmul.f32 %v4248_v55, %v4248_v55 }
 0xf5f   :  { %v4250_v33 = vpop.f32.mrf.mxu0 }
 0xf60   :  { %v1966_v23 = vadd.f32 %v4250_v33, %v4246_v42  ;;  %v1976_v59 = vmul.f32 %v4250_v33, %v4250_v33 }
 0xf62   :  { %v1967_v0 = vadd.f32 %v4244_v19, %v1966_v23  ;;  %v1979_v1 = vadd.f32 %v1976_v59, %v1975_v56  ;;  %v3539_v56 = vld [vmem:[%s4485_s1 + $0x280] sm:$0xff]  }
 0xf63   :  { %v3541_v23 = vld [vmem:[%s4485_s1 + $0x2c0] sm:$0xff]   ;;  %3222 = vmatprep.subr.bf16.mxu1 %v3539_v56 }
 0xf64   :  { %v1968_v3 = vadd.f32 %v4248_v55, %v1967_v0  ;;  %v1980_v4 = vadd.f32 %v1979_v1, %v1977_v29  ;;  %v3540_v59 = vld [vmem:[%s4485_s1 + $0x240] sm:$0xff]   ;;  %3390 = vmatprep.subr.bf16.mxu0 %v3541_v23 }
 0xf65   :  { %3223 = vmatpush3.bf16.msra.mxu1 %v3540_v59  ;;  %3391 = vmatpush3.bf16.msra.mxu0 %v3541_v23 }
 0xf66   :  { %v1969_v5 = vrot.slane %v1968_v3, 4  ;;  %v1981_v6 = vadd.f32 %v1980_v4, %v1978_v2 }
 0xf68   :  { %v1970_v7 = vadd.f32 %v1969_v5, %v1968_v3  ;;  %v1982_v9 = vrot.slane %v1981_v6, 4 }
 0xf6a   :  { %v1971_v10 = vrot.slane %v1970_v7, 2  ;;  %v1983_v11 = vadd.f32 %v1982_v9, %v1981_v6 }
 0xf6c   :  { %v1972_v12 = vadd.f32 %v1971_v10, %v1970_v7  ;;  %v1984_v13 = vrot.slane %v1983_v11, 2  ;;  %v2962_v10 = vld [vmem:[%s4490_s5 + $0x2] sm:$0x1] }
 0xf6e   :  { %v1973_v14 = vrot.slane %v1972_v12, 1  ;;  %v1985_v15 = vadd.f32 %v1984_v13, %v1983_v11  ;;  %v2963_v13 = vld [vmem:[%s4491_s6 + $0x2] sm:$0x1] }
 0xf70   :  { %v1986_v16 = vrot.slane %v1985_v15, 1  ;;  %v1974_v17 = vadd.f32 %v1973_v14, %v1972_v12 }
 0xf72   :  { %v1987_v18 = vadd.f32 %v1986_v16, %v1985_v15 }
 0xf74   :  { %v1988_v20 = vsel %vm124_vm1, %v1974_v17, %v1987_v18 }
 0xf75   :  { %1989 = vrot.lane.b32.xlu0 %v1988_v20, %s3570_s11 }
 0xfe7   :  { %v1990_v24 = vpop.permute.xlu0 %1989 }
 0xfe8   :  { %v1991_v26 = vadd.f32 %v1990_v24, %v1988_v20 }
 0xfea   :  { %1992 = vrot.lane.b32.xlu1 %v1991_v26, %s3571_s12 }
0x105c   :  { %v1993_v28 = vpop.permute.xlu1 %1992 }
0x105d   :  { %v1994_v62 = vadd.f32 %v1993_v28, %v1991_v26 }
0x105f   :  { %1995 = vrot.lane.b32.xlu0 %v1994_v62, %s3572_s13 }
0x10d1   :  { %v1996_v34 = vpop.permute.xlu0 %1995 }
0x10d2   :  { %v1997_v61 = vadd.f32 %v1996_v34, %v1994_v62 }
0x10d4   :  { %1998 = vrot.lane.b32.xlu1 %v1997_v61, %s3573_s14 }
0x1146   :  { %v1999_v29 = vpop.permute.xlu1 %1998 }
0x1147   :  { %v2000_v0 = vadd.f32 %v1999_v29, %v1997_v61 }
0x1149   :  { %v2001_v1 = vmul.f32 0.001953125, %v2000_v0 }
0x114b   :  { %v2004_v2 = vmul.f32 %v2001_v1, %v2001_v1 }
0x114d   :  { %v2006_v3 = vrot.slane %v2004_v2, 7 }
0x114f   :  { %v2008_v4 = vsub.f32 %v2001_v1, %v2006_v3 }
0x1151   :  { %v2009_v5 = vadd.f32 1e-05, %v2008_v4 }
0x1153   :  { %3560 = vrsqrt.f32 %v2009_v5 }
0x1160   :  { %v3561_v6 = vpop.eup %3560 }
0x1161   :  { %v2018_v7 = vrot.slane %v3561_v6, %v3799_v25 }
0x1163   :  { %v2019_v9 = vcombine.high %v2018_v7, %v2018_v7 }
0x1165   :  { %v2026_v11 = vrot.slane %v2019_v9, %v3799_v25 }
0x1167   :  { %v2028_v12 = vmul.f32 %v2962_v10, %v2026_v11 }
0x1169   :  { %v2031_v14 = vmul.f32 %v2028_v12, %v2001_v1  ;;  %v2037_v15 = vrot.slane %v2028_v12, %v3806_v32 }
0x116b   :  { %v2032_v16 = vsub.f32 %v2963_v13, %v2031_v14  ;;  %v2039_v17 = vmul.f32 %v2037_v15, %v4246_v42  ;;  %v2040_v18 = vmul.f32 %v2037_v15, %v4250_v33  ;;  %v2041_v20 = vmul.f32 %v4244_v19, %v2037_v15 }
0x116c   :  { %v2042_v24 = vmul.f32 %v4248_v55, %v2037_v15 }
0x116d   :  { %v2045_v26 = vadd.f32 %v2041_v20, %v4149_v36  ;;  %v2051_v28 = vrot.slane %v2032_v16, %v3806_v32  ;;  %v2043_v62 = vadd.f32 %v2039_v17, %v4151_v37  ;;  %v2044_v34 = vadd.f32 %v2040_v18, %v4153_v45 }
0x116e   :  { %v2046_v61 = vadd.f32 %v2042_v24, %v4155_v58 }
0x116f   :  { %v4359_v44 = vadd.f32 %v2051_v28, %v2045_v26  ;;  %v4361_v30 = vadd.f32 %v2051_v28, %v2043_v62  ;;  %v4363_v42 = vadd.f32 %v2051_v28, %v2044_v34 }
0x1170   :  { %v4365_v33 = vadd.f32 %v2051_v28, %v2046_v61 }
0x1171   :  { %vm2057_vm0 = vcmp.ge.f32.partialorder %v4361_v30, 0.0  ;;  %vm2058_vm2 = vcmp.ge.f32.partialorder %v4363_v42, 0.0  ;;  %v2061_v36 = vmul.f32 0.01, %v4361_v30  ;;  %v2062_v37 = vmul.f32 0.01, %v4363_v42 }
0x1172   :  { %vm2059_vm3 = vcmp.ge.f32.partialorder %v4359_v44, 0.0  ;;  %v2063_v45 = vmul.f32 0.01, %v4359_v44  ;;  %vm2060_vm5 = vcmp.ge.f32.partialorder %v4365_v33, 0.0  ;;  %v2064_v58 = vmul.f32 0.01, %v4365_v33 }
0x1173   :  { %v2065_v19 = vsel %vm2057_vm0, %v4361_v30, %v2061_v36  ;;  %v2066_v55 = vsel %vm2058_vm2, %v4363_v42, %v2062_v37 }
0x1174   :  { %v2073_v31 = vrot.slane %v2065_v19, 7  ;;  %v2074_v21 = vrot.slane %v2066_v55, 7  ;;  %v2090_v38 = vrot.slane %v2066_v55, 1  ;;  %v2106_v41 = vpack.c.bf16 %v2066_v55, %v2065_v19 }
0x1175   :  { %v2067_v43 = vsel %vm2059_vm3, %v4359_v44, %v2063_v45  ;;  %v2068_v46 = vsel %vm2060_vm5, %v4365_v33, %v2064_v58  ;;  %v2089_v47 = vrot.slane %v2065_v19, 1 }
0x1176   :  { %v2084_v8 = vsel %vm124_vm1, 0.0, %v2073_v31  ;;  %v2092_v48 = vrot.slane %v2067_v43, 1  ;;  %2336 = vmatprep.mubr.bf16.mxu1 %v2106_v41  ;;  %v2094_v50 = vrot.slane %v2068_v46, 1  ;;  %v2075_v51 = vsel %vm124_vm1, %v2073_v31, %v2074_v21 }
0x1177   :  { %v2085_v49 = vmul.f32 %v3713_v39, %v2084_v8  ;;  %v2076_v52 = vrot.slane %v2067_v43, 7  ;;  %v2091_v54 = vsel %vm141_vm4, %v2089_v47, %v2090_v38  ;;  %v2109_v22 = vpack.c.bf16 %v2068_v46, %v2067_v43 }
0x1178   :  { %v2093_v27 = vsel %vm141_vm4, %v2090_v38, %v2092_v48  ;;  %v2100_v60 = vsel %vm141_vm4, %v2094_v50, 0.0  ;;  %v2095_v59 = vsel %vm141_vm4, %v2092_v48, %v2094_v50  ;;  %v2078_v29 = vrot.slane %v2068_v46, 7 }
0x1179   :  { %v2105_v57 = vpack.c.bf16 %v2075_v51, %v2085_v49  ;;  %v2102_v53 = vmul.f32 %v3700_v35, %v2093_v27  ;;  %v2104_v56 = vmul.f32 %v3715_v40, %v2100_v60  ;;  %v2077_v23 = vsel %vm124_vm1, %v2074_v21, %v2076_v52 }
0x117a   :  { %v2087_v1 = vmul.f32 %v3739_v63, %v2077_v23  ;;  %v2079_v35 = vsel %vm124_vm1, %v2076_v52, %v2078_v29  ;;  %v3543_v23 = vld [vmem:[%s4487_s4 + $0xf0] sm:$0xff]   ;;  %v3546_v29 = vld [vmem:[%s4487_s4 + $0xd8] sm:$0xff]  }
0x117b   :  { %2337 = vmatmul.mubr.bf16.vlgmr.msra.gmra.mxu1 %v2105_v57  ;;  %v2107_v39 = vpack.c.bf16 %v2102_v53, %v2091_v54  ;;  %v2110_v0 = vpack.c.bf16 %v2104_v56, %v2095_v59  ;;  %v3542_v56 = vld [vmem:[%s4487_s4 + $0xf8] sm:$0xff]   ;;  %v3545_v59 = vld [vmem:[%s4487_s4 + $0xe0] sm:$0xff]  }
0x117c   :  { %2344 = vmatprep.mubr.bf16.mxu1 %v2109_v22  ;;  %v2108_v2 = vpack.c.bf16 %v2079_v35, %v2087_v1  ;;  %3396 = vmatprep.subr.bf16.mxu1 %v3542_v56  ;;  %v3548_v1 = vld [vmem:[%s4487_s4 + $0xc8] sm:$0xff]   ;;  %v3549_v35 = vld [vmem:[%s4487_s4 + $0xc0] sm:$0xff]  }
0x117d   :  { %3392 = vmatprep.mubr.bf16.mxu0 %v2107_v39  ;;  %3397 = vmatpush3.bf16.msra.mxu1 %v3542_v56  ;;  %v3544_v39 = vld [vmem:[%s4487_s4 + $0xe8] sm:$0xff]  }
0x117e   :  { %3393 = vmatmul.mubr.bf16.vlgmr.msra.gmra.mxu0 %v2110_v0  ;;  %3398 = vmatprep.subr.bf16.mxu1 %v3543_v23  ;;  %v3547_v0 = vld [vmem:[%s4487_s4 + $0xd0] sm:$0xff]  }
0x1181   :  { %3399 = vmatpush3.bf16.msra.mxu1 %v3543_v23 }
0x1182   :  { %3400 = vmatprep.subr.bf16.mxu1 %v3544_v39 }
0x1183   :  { %2345 = vmatmul.mubr.bf16.gmra.mxu1 %v2108_v2 }
0x1185   :  { %3401 = vmatpush3.bf16.msra.mxu1 %v3544_v39 }
0x1186   :  { %3402 = vmatprep.subr.bf16.mxu1 %v3545_v59 }
0x1189   :  { %3403 = vmatpush3.bf16.msra.mxu1 %v3545_v59 }
0x118a   :  { %3404 = vmatprep.subr.bf16.mxu1 %v3546_v29 }
0x118d   :  { %3405 = vmatpush3.bf16.msra.mxu1 %v3546_v29 }
0x118e   :  { %3406 = vmatprep.subr.bf16.mxu1 %v3547_v0 }
0x1191   :  { %3407 = vmatpush3.bf16.msra.mxu1 %v3547_v0 }
0x1192   :  { %3408 = vmatprep.subr.bf16.mxu1 %v3548_v1 }
0x1195   :  { %3409 = vmatpush3.bf16.msra.mxu1 %v3548_v1 }
0x1196   :  { %3410 = vmatprep.subr.bf16.mxu1 %v3549_v35 }
0x1199   :  { %3411 = vmatpush3.bf16.msra.mxu1 %v3549_v35 }
0x123b   :  { %v3224_v3 = vpop.f32.mrf.mxu1 }
0x123d   :  { %v3225_v4 = vpop.f32.mrf.mxu1 }
0x123e   :  { %v3394_v40 = vpop.f32.mrf.mxu0  ;;  %v3226_v9 = vadd.f32 %v3225_v4, %v3224_v3 }
0x123f   :  { %v3227_v5 = vpop.f32.mrf.mxu1 }
0x1240   :  { %v2387_v6 = vpop.f32.mrf.mxu0 }
0x1241   :  { %v3228_v7 = vpop.f32.mrf.mxu1  ;;  %v4393_v63 = vadd.f32 %v3226_v9, %v2387_v6 }
0x1242   :  { %v3395_v10 = vpop.f32.mrf.mxu0  ;;  %v3229_v11 = vadd.f32 %v3228_v7, %v3227_v5 }
0x1243   :  { %v3230_v12 = vpop.f32.mrf.mxu1  ;;  %v2411_v26 = vmul.f32 %v4393_v63, %v4393_v63 }
0x1244   :  { %v2390_v13 = vpop.f32.mrf.mxu0 }
0x1245   :  { %v4391_v14 = vadd.f32 %v3229_v11, %v2390_v13  ;;  %v3231_v15 = vpop.f32.mrf.mxu1 }
0x1246   :  { %v3232_v16 = vadd.f32 %v3231_v15, %v3230_v12  ;;  %v3036_v12 = vld [vmem:[%s4488_s2 + $0x3] sm:$0x1] }
0x1247   :  { %v3233_v17 = vpop.f32.mrf.mxu1  ;;  %v2412_v18 = vmul.f32 %v4391_v14, %v4391_v14  ;;  %v2402_v28 = vadd.f32 %v4391_v14, %v4393_v63 }
0x1248   :  { %v4397_v20 = vadd.f32 %v3394_v40, %v3232_v16  ;;  %v3037_v16 = vld [vmem:[%s4489_s3 + $0x3] sm:$0x1] }
0x1249   :  { %v3234_v24 = vpop.f32.mrf.mxu1  ;;  %v2415_v61 = vadd.f32 %v2412_v18, %v2411_v26 }
0x124a   :  { %v2413_v62 = vmul.f32 %v4397_v20, %v4397_v20  ;;  %v3235_v34 = vadd.f32 %v3234_v24, %v3233_v17  ;;  %v2403_v36 = vadd.f32 %v2402_v28, %v4397_v20 }
0x124c   :  { %v4406_v37 = vadd.f32 %v3395_v10, %v3235_v34  ;;  %v2416_v45 = vadd.f32 %v2415_v61, %v2413_v62 }
0x124e   :  { %v2404_v58 = vadd.f32 %v2403_v36, %v4406_v37  ;;  %v2414_v19 = vmul.f32 %v4406_v37, %v4406_v37 }
0x1250   :  { %v2405_v55 = vrot.slane %v2404_v58, 4  ;;  %v2417_v31 = vadd.f32 %v2416_v45, %v2414_v19 }
0x1252   :  { %v2406_v21 = vadd.f32 %v2405_v55, %v2404_v58  ;;  %v2418_v38 = vrot.slane %v2417_v31, 4 }
0x1254   :  { %v2407_v41 = vrot.slane %v2406_v21, 2  ;;  %v2419_v43 = vadd.f32 %v2418_v38, %v2417_v31 }
0x1256   :  { %v2408_v46 = vadd.f32 %v2407_v41, %v2406_v21  ;;  %v2420_v47 = vrot.slane %v2419_v43, 2 }
0x1258   :  { %v2409_v8 = vrot.slane %v2408_v46, 1  ;;  %v2421_v48 = vadd.f32 %v2420_v47, %v2419_v43 }
0x125a   :  { %v2422_v49 = vrot.slane %v2421_v48, 1  ;;  %v2410_v50 = vadd.f32 %v2409_v8, %v2408_v46 }
0x125c   :  { %v2423_v51 = vadd.f32 %v2422_v49, %v2421_v48 }
0x125e   :  { %v2424_v27 = vsel %vm124_vm1, %v2410_v50, %v2423_v51 }
0x125f   :  { %2425 = vrot.lane.b32.xlu0 %v2424_v27, %s3570_s11 }
0x12d1   :  { %v2426_v52 = vpop.permute.xlu0 %2425 }
0x12d2   :  { %v2427_v57 = vadd.f32 %v2426_v52, %v2424_v27 }
0x12d4   :  { %2428 = vrot.lane.b32.xlu1 %v2427_v57, %s3571_s12 }
0x1346   :  { %v2429_v53 = vpop.permute.xlu1 %2428 }
0x1347   :  { %v2430_v60 = vadd.f32 %v2429_v53, %v2427_v57 }
0x1349   :  { %2431 = vrot.lane.b32.xlu0 %v2430_v60, %s3572_s13 }
0x13bb   :  { %v2432_v54 = vpop.permute.xlu0 %2431 }
0x13bc   :  { %v2433_v22 = vadd.f32 %v2432_v54, %v2430_v60 }
0x13be   :  { %2434 = vrot.lane.b32.xlu1 %v2433_v22, %s3573_s14 }
0x1430   :  { %v2435_v2 = vpop.permute.xlu1 %2434 }
0x1431   :  { %v2436_v3 = vadd.f32 %v2435_v2, %v2433_v22 }
0x1433   :  { %v2437_v4 = vmul.f32 0.001953125, %v2436_v3 }
0x1435   :  { %v2440_v40 = vmul.f32 %v2437_v4, %v2437_v4 }
0x1437   :  { %v2442_v5 = vrot.slane %v2440_v40, 7 }
0x1439   :  { %v2444_v6 = vsub.f32 %v2437_v4, %v2442_v5 }
0x143b   :  { %v2445_v7 = vadd.f32 1e-05, %v2444_v6 }
0x143d   :  { %3562 = vrsqrt.f32 %v2445_v7 }
0x144a   :  { %v3563_v9 = vpop.eup %3562 }
0x144b   :  { %v2454_v10 = vrot.slane %v3563_v9, %v3799_v25 }
0x144d   :  { %v2455_v11 = vcombine.high %v2454_v10, %v2454_v10 }
0x144f   :  { %v2462_v13 = vrot.slane %v2455_v11, %v3799_v25 }
0x1451   :  { %v2464_v15 = vmul.f32 %v3036_v12, %v2462_v13 }
0x1453   :  { %v2467_v17 = vmul.f32 %v2464_v15, %v2437_v4  ;;  %v2473_v18 = vrot.slane %v2464_v15, %v3806_v32 }
0x1455   :  { %v2468_v24 = vsub.f32 %v3037_v16, %v2467_v17  ;;  %v2477_v26 = vmul.f32 %v2473_v18, %v4397_v20  ;;  %v2478_v28 = vmul.f32 %v2473_v18, %v4406_v37  ;;  %v2475_v34 = vmul.f32 %v2473_v18, %v4393_v63 }
0x1456   :  { %v2476_v61 = vmul.f32 %v2473_v18, %v4391_v14 }
0x1457   :  { %v2483_v62 = vrot.slane %v2468_v24, %v3806_v32 }
0x1459   :  { %v2485_v36 = vadd.f32 %v2483_v62, %v2475_v34  ;;  %v2486_v45 = vadd.f32 %v2483_v62, %v2476_v61  ;;  %v2487_v58 = vadd.f32 %v2483_v62, %v2477_v26  ;;  %v2488_v19 = vadd.f32 %v2483_v62, %v2478_v28  ;;  %v3062_v61 = vld [vmem:[%s4490_s5 + $0x3] sm:$0x1] }
0x145b   :  { %vm2489_vm4 = vcmp.ge.f32.partialorder %v2485_v36, 0.0  ;;  %vm2490_vm6 = vcmp.ge.f32.partialorder %v2486_v45, 0.0  ;;  %v2493_v55 = vmul.f32 0.01, %v2485_v36  ;;  %v2494_v31 = vmul.f32 0.01, %v2486_v45 }
0x145c   :  { %vm2491_vm7 = vcmp.ge.f32.partialorder %v2487_v58, 0.0  ;;  %vm2492_vm8 = vcmp.ge.f32.partialorder %v2488_v19, 0.0  ;;  %v2495_v21 = vmul.f32 0.01, %v2487_v58  ;;  %v2496_v20 = vmul.f32 0.01, %v2488_v19 }
0x145d   :  { %v2497_v38 = vsel %vm2489_vm4, %v2485_v36, %v2493_v55  ;;  %v2498_v37 = vsel %vm2490_vm6, %v2486_v45, %v2494_v31 }
0x145e   :  { %v2501_v41 = vpack.c.bf16 %v2498_v37, %v2497_v38  ;;  %v2499_v43 = vsel %vm2491_vm7, %v2487_v58, %v2495_v21  ;;  %v2500_v46 = vsel %vm2492_vm8, %v2488_v19, %v2496_v20  ;;  %v3063_v58 = vld [vmem:[%s4491_s6 + $0x3] sm:$0x1] }
0x145f   :  { %v2502_v63 = vpack.c.bf16 %v2500_v46, %v2499_v43 }
0x1460   :  { %3412 = vmatprep.mubr.bf16.mxu1 %v2501_v41 }
0x1461   :  { %3413 = vmatmul.mubr.bf16.vlgmr.msra.gmra.mxu1 %v2502_v63 }
0x1521   :  { %v3414_v14 = vpop.f32.mrf.mxu1 }
0x1522   :  { %v2628_v27 = vmul.f32 %v3414_v14, %v3414_v14 }
0x1523   :  { %v2602_v47 = vpop.f32.mrf.mxu1 }
0x1524   :  { %v2626_v49 = vmul.f32 %v2602_v47, %v2602_v47 }
0x1525   :  { %v3415_v8 = vpop.f32.mrf.mxu1 }
0x1526   :  { %v2629_v53 = vmul.f32 %v3415_v8, %v3415_v8 }
0x1527   :  { %v2605_v48 = vpop.f32.mrf.mxu1 }
0x1528   :  { %v2617_v50 = vadd.f32 %v2605_v48, %v2602_v47  ;;  %v2627_v51 = vmul.f32 %v2605_v48, %v2605_v48 }
0x152a   :  { %v2618_v52 = vadd.f32 %v3414_v14, %v2617_v50  ;;  %v2630_v57 = vadd.f32 %v2627_v51, %v2626_v49 }
0x152c   :  { %v2619_v60 = vadd.f32 %v3415_v8, %v2618_v52  ;;  %v2631_v54 = vadd.f32 %v2630_v57, %v2628_v27 }
0x152e   :  { %v2620_v22 = vrot.slane %v2619_v60, 4  ;;  %v2632_v56 = vadd.f32 %v2631_v54, %v2629_v53 }
0x1530   :  { %v2621_v23 = vadd.f32 %v2620_v22, %v2619_v60  ;;  %v2633_v39 = vrot.slane %v2632_v56, 4 }
0x1532   :  { %v2622_v59 = vrot.slane %v2621_v23, 2  ;;  %v2634_v29 = vadd.f32 %v2633_v39, %v2632_v56 }
0x1534   :  { %v2623_v0 = vadd.f32 %v2622_v59, %v2621_v23  ;;  %v2635_v1 = vrot.slane %v2634_v29, 2 }
0x1536   :  { %v2624_v35 = vrot.slane %v2623_v0, 1  ;;  %v2636_v2 = vadd.f32 %v2635_v1, %v2634_v29 }
0x1538   :  { %v2637_v3 = vrot.slane %v2636_v2, 1  ;;  %v2625_v4 = vadd.f32 %v2624_v35, %v2623_v0 }
0x153a   :  { %v2638_v40 = vadd.f32 %v2637_v3, %v2636_v2 }
0x153c   :  { %v2639_v5 = vsel %vm124_vm1, %v2625_v4, %v2638_v40 }
0x153d   :  { %2640 = vrot.lane.b32.xlu0 %v2639_v5, %s3570_s11 }
0x15af   :  { %v2641_v6 = vpop.permute.xlu0 %2640 }
0x15b0   :  { %v2642_v7 = vadd.f32 %v2641_v6, %v2639_v5 }
0x15b2   :  { %2643 = vrot.lane.b32.xlu1 %v2642_v7, %s3571_s12 }
0x1624   :  { %v2644_v9 = vpop.permute.xlu1 %2643 }
0x1625   :  { %v2645_v10 = vadd.f32 %v2644_v9, %v2642_v7 }
0x1627   :  { %2646 = vrot.lane.b32.xlu0 %v2645_v10, %s3572_s13 }
0x1699   :  { %v2647_v11 = vpop.permute.xlu0 %2646 }
0x169a   :  { %v2648_v12 = vadd.f32 %v2647_v11, %v2645_v10 }
0x169c   :  { %2649 = vrot.lane.b32.xlu1 %v2648_v12, %s3573_s14 }
0x170e   :  { %v2650_v13 = vpop.permute.xlu1 %2649 }
0x170f   :  { %v2651_v15 = vadd.f32 %v2650_v13, %v2648_v12 }
0x1711   :  { %v2652_v16 = vmul.f32 0.001953125, %v2651_v15 }
0x1713   :  { %v2655_v17 = vmul.f32 %v2652_v16, %v2652_v16 }
0x1715   :  { %v2657_v18 = vrot.slane %v2655_v17, 7 }
0x1717   :  { %v2659_v24 = vsub.f32 %v2652_v16, %v2657_v18 }
0x1719   :  { %v2660_v26 = vadd.f32 1e-05, %v2659_v24 }
0x171b   :  { %3564 = vrsqrt.f32 %v2660_v26 }
0x1728   :  { %v3565_v28 = vpop.eup %3564 }
0x1729   :  { %v2669_v62 = vrot.slane %v3565_v28, %v3799_v25 }
0x172b   :  { %v2670_v34 = vcombine.high %v2669_v62, %v2669_v62 }
0x172d   :  { %v2677_v36 = vrot.slane %v2670_v34, %v3799_v25 }
0x172f   :  { %v2679_v45 = vmul.f32 %v3062_v61, %v2677_v36 }
0x1731   :  { %v2682_v19 = vmul.f32 %v2679_v45, %v2652_v16  ;;  %v2688_v55 = vrot.slane %v2679_v45, %v3806_v32 }
0x1733   :  { %v2683_v31 = vsub.f32 %v3063_v58, %v2682_v19  ;;  %v2690_v21 = vmul.f32 %v2688_v55, %v2602_v47  ;;  %v2691_v20 = vmul.f32 %v2688_v55, %v2605_v48  ;;  %v2692_v38 = vmul.f32 %v3414_v14, %v2688_v55 }
0x1734   :  { %v2693_v37 = vmul.f32 %v3415_v8, %v2688_v55 }
0x1735   :  { %v2694_v41 = vadd.f32 %v2690_v21, %v4361_v30  ;;  %v2695_v43 = vadd.f32 %v2691_v20, %v4363_v42  ;;  %v2696_v46 = vadd.f32 %v2692_v38, %v4359_v44  ;;  %v2702_v25 = vrot.slane %v2683_v31, %v3806_v32 }
0x1736   :  { %v2697_v63 = vadd.f32 %v2693_v37, %v4365_v33 }
0x1737   :  { %v2704_v49 = vadd.f32 %v2702_v25, %v2694_v41  ;;  %v2705_v50 = vadd.f32 %v2702_v25, %v2695_v43  ;;  %v2706_v51 = vadd.f32 %v2702_v25, %v2696_v46 }
0x1738   :  { %v2707_v27 = vadd.f32 %v2702_v25, %v2697_v63 }
0x1739   :  { %vm2708_vm1 = vcmp.ge.f32.partialorder %v2704_v49, 0.0  ;;  %vm2709_vm9 = vcmp.ge.f32.partialorder %v2705_v50, 0.0  ;;  %vm2710_vm10 = vcmp.ge.f32.partialorder %v2706_v51, 0.0  ;;  %v2712_v47 = vmul.f32 0.01, %v2704_v49 }
0x173a   :  { %vm2711_vm11 = vcmp.ge.f32.partialorder %v2707_v27, 0.0  ;;  %v2713_v14 = vmul.f32 0.01, %v2705_v50  ;;  %v2714_v8 = vmul.f32 0.01, %v2706_v51 }
0x173b   :  { %v2715_v30 = vmul.f32 0.01, %v2707_v27  ;;  %v2716_v48 = vsel %vm2708_vm1, %v2704_v49, %v2712_v47 }
0x173c   :  { %v2717_v42 = vsel %vm2709_vm9, %v2705_v50, %v2713_v14  ;;  %v2718_v52 = vsel %vm2710_vm10, %v2706_v51, %v2714_v8  ;;  %2720 = vst [vmem:[%s4492_s7] sm:$0xff] %v2716_v48 }
0x173d   :  { %v2719_v32 = vsel %vm2711_vm11, %v2707_v27, %v2715_v30  ;;  %2721 = vst [vmem:[%s4492_s7 + $0x8] sm:$0xff] %v2717_v42  ;;  %2722 = vst [vmem:[%s4492_s7 + $0x10] sm:$0xff] %v2718_v52 }
0x173e   :  { %2723 = vst [vmem:[%s4492_s7 + $0x18] sm:$0xff] %v2719_v32 }

</bundles_post_ra>
